<compile_context>
chip_gen: v7x
topology: tpu7x:2x2x1
jax: 0.10.0
libtpu: 0.0.40
codegen_flags: <defaults>
</compile_context>

<pallas_src>
import functools
import math

import jax
import jax.numpy as jnp
from jax import lax
from jax.experimental import pallas as pl
from jax.experimental.pallas import tpu as pltpu

INF = 1.0e10


def _multihead_kernel(q_ref, k_ref, v_ref, wq_ref, wk_ref, wv_ref, wo_ref,
                      o_ref, acc_ref, kc_ref, vc_ref, *,
                      n_hg, heads_per_group, hd_k, hd_v, tq, causal,
                      compute_dtype, approx_recip):
    # Grid: (batch, q_tile, head_group). head_group is the innermost
    # accumulation axis; q_tile carries the K/V-projection cache dependency.
    qt = pl.program_id(1)
    hg = pl.program_id(2)
    cd = compute_dtype

    @pl.when(hg == 0)
    def _():
        acc_ref[...] = jnp.zeros_like(acc_ref)

    # K/V projections depend only on (batch, head_group): compute them once at
    # the first query tile of each batch row and cache them in VMEM so later q
    # tiles reuse them instead of redoing the projection matmuls.
    @pl.when(qt == 0)
    def _():
        xk = k_ref[0].astype(cd)                              # (S_kv, d_key)
        xv = v_ref[0].astype(cd)                              # (S_kv, d_val)
        kc_ref[hg] = jnp.dot(xk, wk_ref[hg],
                             preferred_element_type=jnp.float32).astype(cd)
        vc_ref[hg] = jnp.dot(xv, wv_ref[hg],
                             preferred_element_type=jnp.float32).astype(cd)

    # Q projection for all heads of this group in one wide matmul; 1/scale is
    # already folded into wq by the wrapper.
    xq = q_ref[0].astype(cd)                                  # (tq, d_key)
    qg = jnp.dot(xq, wq_ref[hg],
                 preferred_element_type=jnp.float32).astype(cd)  # (tq, G*hd_k)
    kg = kc_ref[hg]                                           # (S_kv, G*hd_k)
    vg = vc_ref[hg]                                           # (S_kv, G*hd_v)
    s_kv = kg.shape[0]

    if causal:
        # The module subtracts INF from the raw scores before dividing by
        # scale; with the scale folded into wq, subtracting INF directly is
        # identical after softmax (exp -> 0). Head-independent, so hoisted
        # out of the per-head loop.
        row = qt * tq + lax.broadcasted_iota(jnp.int32, (tq, s_kv), 0)
        col = lax.broadcasted_iota(jnp.int32, (tq, s_kv), 1)
        mask = jnp.where(col > row, -INF, 0.0)

    # Per-head attention, statically unrolled over the heads of this group.
    head_outs = []
    for h in range(heads_per_group):
        qh = qg[:, h * hd_k:(h + 1) * hd_k]
        kh = kg[:, h * hd_k:(h + 1) * hd_k]
        vh = vg[:, h * hd_v:(h + 1) * hd_v]
        # Scores (tq, S_kv): contract the head dims directly (no kh.T relayout).
        s = lax.dot_general(qh, kh, (((1,), (1,)), ((), ())),
                            preferred_element_type=jnp.float32)
        if causal:
            s = s + mask
        # Numerically-stabilized softmax along keys; normalization is applied
        # to the (tq, hd_v) head output rather than the (tq, S_kv) probs.
        s = s - jnp.max(s, axis=-1, keepdims=True)
        p = jnp.exp(s)
        l = jnp.sum(p, axis=-1, keepdims=True)
        ho = jnp.dot(p.astype(cd), vh, preferred_element_type=jnp.float32)
        ho = ho * pl.reciprocal(l, approx=approx_recip)
        head_outs.append(ho.astype(cd))

    group_out = (head_outs[0] if heads_per_group == 1
                 else jnp.concatenate(head_outs, axis=-1))    # (tq, G*hd_v)

    # Fold the output projection per head-group and accumulate in f32.
    acc_ref[...] += jnp.dot(group_out, wo_ref[hg],
                            preferred_element_type=jnp.float32)

    @pl.when(hg == n_hg - 1)
    def _():
        o_ref[0] = acc_ref[...].astype(o_ref.dtype)
    # TODO(synk): training-mode dropout (drop_ratio > 0) is not implemented;
    # this kernel matches the module in eval mode only.
    # TODO(synk): for very long S_kv switch to a KV grid axis with an online
    # (flash) softmax instead of full-S resident K/V + (tq, S_kv) temporaries.


def _spec(block_shape, index_map, single_buffer=False):
    """BlockSpec helper: resident / rarely-changing blocks can be single
    buffered (pl.Buffered(1)) to halve their VMEM footprint (matters most on
    v7x's 64 MiB VMEM). Falls back gracefully if this Pallas version does not
    expose pipeline_mode."""
    if single_buffer:
        try:
            return pl.BlockSpec(block_shape, index_map,
                                pipeline_mode=pl.Buffered(1))
        except Exception:
            pass
    return pl.BlockSpec(block_shape, index_map)


def multihead_pallas(q, k, v, wq, wk, wv, wo, *, n_heads, causal=False,
                     q_tile=512, heads_per_group=None, compute_dtype=None):
    B, Sq, d_key = q.shape
    S_kv = k.shape[1]
    d_val = v.shape[-1]
    assert k.shape == (B, S_kv, d_key) and v.shape == (B, S_kv, d_val)
    assert d_key % n_heads == 0 and d_val % n_heads == 0
    hd_k = d_key // n_heads
    hd_v = d_val // n_heads
    scale = math.sqrt(float(d_key))            # full d_key, as in the module

    # MXU-friendly operand dtype (f32 accumulation is kept regardless).
    if compute_dtype is None:
        compute_dtype = jnp.bfloat16 if q.dtype == jnp.float32 else q.dtype
    compute_dtype = jnp.dtype(compute_dtype)

    # Head packing: G heads per grid step so the per-group projection matmuls
    # are >= ~128 lanes wide and the fixed per-grid-step overhead divides by G.
    if heads_per_group is None:
        heads_per_group = max(1, min(n_heads, -(-128 // hd_k)))
    heads_per_group = max(1, min(int(heads_per_group), n_heads))
    while n_heads % heads_per_group != 0:
        heads_per_group -= 1
    n_hg = n_heads // heads_per_group
    ghd_k = heads_per_group * hd_k
    ghd_v = heads_per_group * hd_v

    # Query tile: multiple of the compute dtype's sublane packing (8 f32 /
    # 16 bf16 / 32 int8) that divides Sq, else fall back to the full sequence.
    sub = max(8, 32 // compute_dtype.itemsize)
    tq = min(int(q_tile), Sq)
    if Sq % tq != 0 or tq % sub != 0:
        tq = Sq
        for cand in (1024, 512, 256, 128, 64, 32, 16):
            if cand <= Sq and Sq % cand == 0 and cand % sub == 0:
                tq = cand
                break

    # Generation-aware scoped-VMEM budget: ~80% of physical VMEM, capped at
    # 100 MiB (v5e/v6e: 128 MiB physical -> ~100 MiB; v7x: 64 MiB -> ~51 MiB).
    try:
        vmem_cap = int(pltpu.get_tpu_info().vmem_capacity_bytes)
    except Exception:
        vmem_cap = 64 * 2**20
    budget = min(int(vmem_cap * 0.8), 100 * 2**20)

    in_b = jnp.dtype(q.dtype).itemsize
    cd_b = compute_dtype.itemsize

    def vmem_needed(tq_, kv_bufs):
        blocks = (2 * tq_ * d_key * in_b                          # q tile (2 bufs)
                  + kv_bufs * S_kv * (d_key + d_val) * in_b       # resident K/V
                  + (2 * d_key * d_key + d_val * d_val + d_val * d_key) * cd_b
                  + 2 * tq_ * d_key * in_b)                       # out tile (2 bufs)
        scratch = (tq_ * d_key * 4                                # f32 accumulator
                   + S_kv * (d_key + d_val) * cd_b)               # K/V proj cache
        temps = 4 * tq_ * S_kv * 4                                # score/prob temps
        return blocks + scratch + temps

    # Single-buffer the resident K/V inputs only when double-buffering would
    # not fit the budget (v7x / long-S case); then shrink tq if still needed.
    single_buffer_kv = vmem_needed(tq, 2) > budget
    kv_bufs = 1 if single_buffer_kv else 2
    while (vmem_needed(tq, kv_bufs) > budget and tq % (2 * sub) == 0
           and Sq % (tq // 2) == 0):
        tq //= 2
    n_qt = Sq // tq

    # One-time wrapper-side layout plumbing: transpose to (in, out), split the
    # out axis into head groups, fold 1/scale into wq, cast to compute dtype.
    wqT_g = ((wq / scale).T.reshape(d_key, n_hg, ghd_k)
             .transpose(1, 0, 2).astype(compute_dtype))           # (n_hg, d_key, G*hd_k)
    wkT_g = (wk.T.reshape(d_key, n_hg, ghd_k)
             .transpose(1, 0, 2).astype(compute_dtype))           # (n_hg, d_key, G*hd_k)
    wvT_g = (wv.T.reshape(d_val, n_hg, ghd_v)
             .transpose(1, 0, 2).astype(compute_dtype))           # (n_hg, d_val, G*hd_v)
    woT_g = wo.T.reshape(n_hg, ghd_v, d_key).astype(compute_dtype)  # (n_hg, G*hd_v, d_key)

    kernel = functools.partial(
        _multihead_kernel, n_hg=n_hg, heads_per_group=heads_per_group,
        hd_k=hd_k, hd_v=hd_v, tq=tq, causal=causal,
        compute_dtype=compute_dtype,
        approx_recip=(compute_dtype != jnp.dtype(jnp.float32)))

    def run(allow_single_buffer):
        sb_w = allow_single_buffer                 # weights never change
        sb_kv = allow_single_buffer and single_buffer_kv
        grid_spec = pltpu.PrefetchScalarGridSpec(
            num_scalar_prefetch=0,
            grid=(B, n_qt, n_hg),
            in_specs=[
                # q tile: changes only with (b, qt).
                pl.BlockSpec((1, tq, d_key), lambda b, t, g: (b, t, 0)),
                # K/V: resident across q tiles and head groups (index changes
                # only with b -> no re-DMA within a batch row).
                _spec((1, S_kv, d_key), lambda b, t, g: (b, 0, 0), sb_kv),
                _spec((1, S_kv, d_val), lambda b, t, g: (b, 0, 0), sb_kv),
                # Weight slabs: full arrays with a constant block index ->
                # DMA'd once and fully resident for the whole grid.
                _spec((n_hg, d_key, ghd_k), lambda b, t, g: (0, 0, 0), sb_w),
                _spec((n_hg, d_key, ghd_k), lambda b, t, g: (0, 0, 0), sb_w),
                _spec((n_hg, d_val, ghd_v), lambda b, t, g: (0, 0, 0), sb_w),
                _spec((n_hg, ghd_v, d_key), lambda b, t, g: (0, 0, 0), sb_w),
            ],
            out_specs=pl.BlockSpec((1, tq, d_key), lambda b, t, g: (b, t, 0)),
            scratch_shapes=[
                pltpu.VMEM((tq, d_key), jnp.float32),             # output accumulator
                pltpu.VMEM((n_hg, S_kv, ghd_k), compute_dtype),   # cached K projection
                pltpu.VMEM((n_hg, S_kv, ghd_v), compute_dtype),   # cached V projection
            ],
        )
        return pl.pallas_call(
            kernel,
            out_shape=jax.ShapeDtypeStruct((B, Sq, d_key), q.dtype),
            grid_spec=grid_spec,
            compiler_params=pltpu.CompilerParams(
                # Batch axis shards across v7x's 2 TensorCores; q-tile and
                # head-group axes carry scratch dependencies -> "arbitrary".
                dimension_semantics=("parallel", "arbitrary", "arbitrary"),
                vmem_limit_bytes=budget,
            ),
        )(q, k, v, wqT_g, wkT_g, wvT_g, woT_g)

    try:
        return run(True)
    except Exception:
        # pl.Buffered(1) single-buffering may be unsupported by some Pallas
        # versions; retry with default double buffering.
        return run(False)


def multihead_reference(q, k, v, wq, wk, wv, wo, *, n_heads, causal=False):
    """Pure-JAX reference mirroring the PyTorch forward (eval mode)."""
    d_key = q.shape[-1]
    scale = math.sqrt(float(d_key))
    hi = jax.lax.Precision.HIGHEST
    qp = jnp.matmul(q, wq.T, precision=hi)
    kp = jnp.matmul(k, wk.T, precision=hi)
    vp = jnp.matmul(v, wv.T, precision=hi)
    hd_k = qp.shape[-1] // n_heads
    hd_v = vp.shape[-1] // n_heads
    S = k.shape[1]
    outs = []
    for h in range(n_heads):
        qh = qp[..., h * hd_k:(h + 1) * hd_k]
        kh = kp[..., h * hd_k:(h + 1) * hd_k]
        vh = vp[..., h * hd_v:(h + 1) * hd_v]
        s = jnp.einsum("bqd,bkd->bqk", qh, kh, precision=hi)
        if causal:
            row = lax.broadcasted_iota(jnp.int32, (S, S), 0)
            col = lax.broadcasted_iota(jnp.int32, (S, S), 1)
            s = s - jnp.where(col > row, INF, 0.0)[None]
        p = jax.nn.softmax(s / scale, axis=-1)
        outs.append(jnp.einsum("bqk,bkd->bqd", p, vh, precision=hi))
    return jnp.matmul(jnp.concatenate(outs, axis=-1), wo.T, precision=hi)


if __name__ == "__main__":
    B, S = 2, 8
    d_key, d_value, n_heads = 32, 32, 4

    key = jax.random.PRNGKey(0)
    kq, kk, kv_, k1, k2, k3, k4 = jax.random.split(key, 7)

    q = jax.random.normal(kq, (B, S, d_key), dtype=jnp.float32)
    kx = jax.random.normal(kk, (B, S, d_key), dtype=jnp.float32)
    vx = jax.random.normal(kv_, (B, S, d_value), dtype=jnp.float32)

    # Deterministic weights (nn.Linear layout: (out_features, in_features)).
    wq = jax.random.normal(k1, (d_key, d_key), dtype=jnp.float32) / math.sqrt(d_key)
    wk = jax.random.normal(k2, (d_key, d_key), dtype=jnp.float32) / math.sqrt(d_key)
    wv = jax.random.normal(k3, (d_value, d_value), dtype=jnp.float32) / math.sqrt(d_value)
    wo = jax.random.normal(k4, (d_key, d_value), dtype=jnp.float32) / math.sqrt(d_value)

    for causal in (False, True):
        ref = multihead_reference(q, kx, vx, wq, wk, wv, wo,
                                  n_heads=n_heads, causal=causal)

        # Strict-parity path: f32 MXU operands, exact softmax reciprocal.
        out32 = jax.block_until_ready(
            multihead_pallas(q, kx, vx, wq, wk, wv, wo, n_heads=n_heads,
                             causal=causal, compute_dtype=jnp.float32))
        assert out32.shape == (B, S, d_key)
        assert jnp.allclose(out32, ref, atol=5e-3, rtol=5e-3), (
            f"f32-path mismatch vs reference (causal={causal})")

        # Default fast path: bf16 MXU operands with f32 accumulation.
        outbf = jax.block_until_ready(
            multihead_pallas(q, kx, vx, wq, wk, wv, wo, n_heads=n_heads,
                             causal=causal))
        assert outbf.shape == (B, S, d_key)
        assert jnp.allclose(outbf, ref, atol=1e-1, rtol=1e-1), (
            f"bf16-path mismatch vs reference (causal={causal})")

    print("KERNEL_OK")
</pallas_src>

<mosaic_0001>
module attributes {stable_mosaic.version = 11 : i64} {
  func.func @_multihead_kernel(%arg0: i32, %arg1: i32, %arg2: i32, %arg3: memref<1x8x32xf32, #tpu.memory_space<vmem>>, %arg4: memref<1x8x32xf32, #tpu.memory_space<vmem>>, %arg5: memref<1x8x32xf32, #tpu.memory_space<vmem>>, %arg6: memref<1x32x32xf32, #tpu.memory_space<vmem>>, %arg7: memref<1x32x32xf32, #tpu.memory_space<vmem>>, %arg8: memref<1x32x32xf32, #tpu.memory_space<vmem>>, %arg9: memref<1x32x32xf32, #tpu.memory_space<vmem>>, %arg10: memref<1x8x32xf32, #tpu.memory_space<vmem>>, %arg11: memref<8x32xf32, #tpu.memory_space<vmem>>, %arg12: memref<1x8x32xf32, #tpu.memory_space<vmem>>, %arg13: memref<1x8x32xf32, #tpu.memory_space<vmem>>) attributes {dimension_semantics = [#tpu.dimension_semantics<parallel>, #tpu.dimension_semantics<arbitrary>, #tpu.dimension_semantics<arbitrary>], iteration_bounds = array<i64: 2, 1, 1>, scalar_prefetch = 0 : i64, scratch_operands = 3 : i64, tpu.core_type = #tpu.core_type<tc>, window_params = [{transform_indices = @transform_0, window_bounds = array<i64: 1, 8, 32>}, {transform_indices = @transform_1, window_bounds = array<i64: 1, 8, 32>}, {transform_indices = @transform_2, window_bounds = array<i64: 1, 8, 32>}, {pipeline_mode = #tpu.pipeline_mode<synchronous>, transform_indices = @transform_3, window_bounds = array<i64: 1, 32, 32>}, {pipeline_mode = #tpu.pipeline_mode<synchronous>, transform_indices = @transform_4, window_bounds = array<i64: 1, 32, 32>}, {pipeline_mode = #tpu.pipeline_mode<synchronous>, transform_indices = @transform_5, window_bounds = array<i64: 1, 32, 32>}, {pipeline_mode = #tpu.pipeline_mode<synchronous>, transform_indices = @transform_6, window_bounds = array<i64: 1, 32, 32>}, {transform_indices = @transform_7, window_bounds = array<i64: 1, 8, 32>}]} {
    %c0_i32 = arith.constant 0 : i32
    %0 = arith.cmpi eq, %arg2, %c0_i32 : i32
    %1 = arith.extui %0 : i1 to i32
    %c0_i32_0 = arith.constant 0 : i32
    %2 = arith.cmpi ne, %1, %c0_i32_0 : i32
    scf.if %2 {
      %cst_36 = arith.constant 0.000000e+00 : f32
      %89 = vector.broadcast %cst_36 : f32 to vector<8x32xf32>
      %c0_37 = arith.constant 0 : index
      %c0_38 = arith.constant 0 : index
      %90 = vector.load %arg11[%c0_37, %c0_38] : memref<8x32xf32, #tpu.memory_space<vmem>>, vector<8x32xf32>
      tpu.vector_store %arg11[%c0_37, %c0_38], %89 {strides = array<i32>} : memref<8x32xf32, #tpu.memory_space<vmem>>, vector<8x32xf32>,
    } else {
    }
    %c0_i32_1 = arith.constant 0 : i32
    %3 = arith.cmpi eq, %arg1, %c0_i32_1 : i32
    %4 = arith.extui %3 : i1 to i32
    %c0_i32_2 = arith.constant 0 : i32
    %5 = arith.cmpi ne, %4, %c0_i32_2 : i32
    scf.if %5 {
      %c0_36 = arith.constant 0 : index
      %c0_37 = arith.constant 0 : index
      %c0_38 = arith.constant 0 : index
      %89 = vector.load %arg4[%c0_36, %c0_37, %c0_38] : memref<1x8x32xf32, #tpu.memory_space<vmem>>, vector<1x8x32xf32>
      %90 = vector.shape_cast %89 : vector<1x8x32xf32> to vector<8x32xf32>
      %c0_39 = arith.constant 0 : index
      %c0_40 = arith.constant 0 : index
      %c0_41 = arith.constant 0 : index
      %91 = vector.load %arg5[%c0_39, %c0_40, %c0_41] : memref<1x8x32xf32, #tpu.memory_space<vmem>>, vector<1x8x32xf32>
      %92 = vector.shape_cast %91 : vector<1x8x32xf32> to vector<8x32xf32>
      %93 = arith.index_cast %arg2 : i32 to index
      %c0_42 = arith.constant 0 : index
      %c0_43 = arith.constant 0 : index
      %94 = vector.load %arg7[%93, %c0_42, %c0_43] : memref<1x32x32xf32, #tpu.memory_space<vmem>>, vector<1x32x32xf32>
      %95 = vector.shape_cast %94 : vector<1x32x32xf32> to vector<32x32xf32>
      %cst_44 = arith.constant dense<0.000000e+00> : vector<8x32xf32>
      %96 = tpu.matmul %90, %95, %cst_44 {dimension_numbers = #tpu.dot_dimension_numbers<[1], [0], [0], [1], [0, 0, 1, 1], [], []>} : vector<8x32xf32>, vector<32x32xf32>, vector<8x32xf32> -> vector<8x32xf32>
      %97 = arith.index_cast %arg2 : i32 to index
      %c0_45 = arith.constant 0 : index
      %c0_46 = arith.constant 0 : index
      %98 = vector.load %arg12[%97, %c0_45, %c0_46] : memref<1x8x32xf32, #tpu.memory_space<vmem>>, vector<1x8x32xf32>
      %99 = vector.shape_cast %98 : vector<1x8x32xf32> to vector<8x32xf32>
      %100 = vector.shape_cast %96 : vector<8x32xf32> to vector<1x8x32xf32>
      tpu.vector_store %arg12[%97, %c0_45, %c0_46], %100 {strides = array<i32>} : memref<1x8x32xf32, #tpu.memory_space<vmem>>, vector<1x8x32xf32>,
      %101 = arith.index_cast %arg2 : i32 to index
      %c0_47 = arith.constant 0 : index
      %c0_48 = arith.constant 0 : index
      %102 = vector.load %arg8[%101, %c0_47, %c0_48] : memref<1x32x32xf32, #tpu.memory_space<vmem>>, vector<1x32x32xf32>
      %103 = vector.shape_cast %102 : vector<1x32x32xf32> to vector<32x32xf32>
      %cst_49 = arith.constant dense<0.000000e+00> : vector<8x32xf32>
      %104 = tpu.matmul %92, %103, %cst_49 {dimension_numbers = #tpu.dot_dimension_numbers<[1], [0], [0], [1], [0, 0, 1, 1], [], []>} : vector<8x32xf32>, vector<32x32xf32>, vector<8x32xf32> -> vector<8x32xf32>
      %105 = arith.index_cast %arg2 : i32 to index
      %c0_50 = arith.constant 0 : index
      %c0_51 = arith.constant 0 : index
      %106 = vector.load %arg13[%105, %c0_50, %c0_51] : memref<1x8x32xf32, #tpu.memory_space<vmem>>, vector<1x8x32xf32>
      %107 = vector.shape_cast %106 : vector<1x8x32xf32> to vector<8x32xf32>
      %108 = vector.shape_cast %104 : vector<8x32xf32> to vector<1x8x32xf32>
      tpu.vector_store %arg13[%105, %c0_50, %c0_51], %108 {strides = array<i32>} : memref<1x8x32xf32, #tpu.memory_space<vmem>>, vector<1x8x32xf32>,
    } else {
    }
    %c0 = arith.constant 0 : index
    %c0_3 = arith.constant 0 : index
    %c0_4 = arith.constant 0 : index
    %6 = vector.load %arg3[%c0, %c0_3, %c0_4] : memref<1x8x32xf32, #tpu.memory_space<vmem>>, vector<1x8x32xf32>
    %7 = vector.shape_cast %6 : vector<1x8x32xf32> to vector<8x32xf32>
    %8 = arith.index_cast %arg2 : i32 to index
    %c0_5 = arith.constant 0 : index
    %c0_6 = arith.constant 0 : index
    %9 = vector.load %arg6[%8, %c0_5, %c0_6] : memref<1x32x32xf32, #tpu.memory_space<vmem>>, vector<1x32x32xf32>
    %10 = vector.shape_cast %9 : vector<1x32x32xf32> to vector<32x32xf32>
    %cst = arith.constant dense<0.000000e+00> : vector<8x32xf32>
    %11 = tpu.matmul %7, %10, %cst {dimension_numbers = #tpu.dot_dimension_numbers<[1], [0], [0], [1], [0, 0, 1, 1], [], []>} : vector<8x32xf32>, vector<32x32xf32>, vector<8x32xf32> -> vector<8x32xf32>
    %12 = arith.index_cast %arg2 : i32 to index
    %c0_7 = arith.constant 0 : index
    %c0_8 = arith.constant 0 : index
    %13 = vector.load %arg12[%12, %c0_7, %c0_8] : memref<1x8x32xf32, #tpu.memory_space<vmem>>, vector<1x8x32xf32>
    %14 = vector.shape_cast %13 : vector<1x8x32xf32> to vector<8x32xf32>
    %15 = arith.index_cast %arg2 : i32 to index
    %c0_9 = arith.constant 0 : index
    %c0_10 = arith.constant 0 : index
    %16 = vector.load %arg13[%15, %c0_9, %c0_10] : memref<1x8x32xf32, #tpu.memory_space<vmem>>, vector<1x8x32xf32>
    %17 = vector.shape_cast %16 : vector<1x8x32xf32> to vector<8x32xf32>
    %18 = vector.extract_strided_slice %11 {offsets = [0, 0], sizes = [8, 8], strides = [1, 1]} : vector<8x32xf32> to vector<8x8xf32>
    %19 = vector.extract_strided_slice %14 {offsets = [0, 0], sizes = [8, 8], strides = [1, 1]} : vector<8x32xf32> to vector<8x8xf32>
    %20 = vector.extract_strided_slice %17 {offsets = [0, 0], sizes = [8, 8], strides = [1, 1]} : vector<8x32xf32> to vector<8x8xf32>
    %cst_11 = arith.constant dense<0.000000e+00> : vector<8x8xf32>
    %21 = tpu.matmul %18, %19, %cst_11 {dimension_numbers = #tpu.dot_dimension_numbers<[1], [1], [0], [0], [0, 0, 1, 0], [], []>} : vector<8x8xf32>, vector<8x8xf32>, vector<8x8xf32> -> vector<8x8xf32>
    %cst_12 = arith.constant dense<0xFF800000> : vector<8xf32>
    %22 = vector.multi_reduction <maximumf>, %21, %cst_12 [1] : vector<8x8xf32> to vector<8xf32>
    %23 = vector.shape_cast %22 : vector<8xf32> to vector<8x1xf32>
    %24 = vector.broadcast %23 : vector<8x1xf32> to vector<8x8xf32>
    %25 = arith.subf %21, %24 : vector<8x8xf32>
    %26 = math.exp %25 : vector<8x8xf32>
    %cst_13 = arith.constant dense<0.000000e+00> : vector<8xf32>
    %27 = vector.multi_reduction <add>, %26, %cst_13 [1] : vector<8x8xf32> to vector<8xf32>
    %28 = vector.shape_cast %27 : vector<8xf32> to vector<8x1xf32>
    %cst_14 = arith.constant dense<0.000000e+00> : vector<8x8xf32>
    %29 = tpu.matmul %26, %20, %cst_14 {dimension_numbers = #tpu.dot_dimension_numbers<[1], [0], [0], [1], [0, 0, 1, 1], [], []>} : vector<8x8xf32>, vector<8x8xf32>, vector<8x8xf32> -> vector<8x8xf32>
    %30 = tpu.reciprocal %28 : vector<8x1xf32> -> vector<8x1xf32>
    %31 = vector.broadcast %30 : vector<8x1xf32> to vector<8x8xf32>
    %32 = arith.mulf %29, %31 : vector<8x8xf32>
    %33 = vector.extract_strided_slice %11 {offsets = [0, 8], sizes = [8, 8], strides = [1, 1]} : vector<8x32xf32> to vector<8x8xf32>
    %34 = vector.extract_strided_slice %14 {offsets = [0, 8], sizes = [8, 8], strides = [1, 1]} : vector<8x32xf32> to vector<8x8xf32>
    %35 = vector.extract_strided_slice %17 {offsets = [0, 8], sizes = [8, 8], strides = [1, 1]} : vector<8x32xf32> to vector<8x8xf32>
    %cst_15 = arith.constant dense<0.000000e+00> : vector<8x8xf32>
    %36 = tpu.matmul %33, %34, %cst_15 {dimension_numbers = #tpu.dot_dimension_numbers<[1], [1], [0], [0], [0, 0, 1, 0], [], []>} : vector<8x8xf32>, vector<8x8xf32>, vector<8x8xf32> -> vector<8x8xf32>
    %cst_16 = arith.constant dense<0xFF800000> : vector<8xf32>
    %37 = vector.multi_reduction <maximumf>, %36, %cst_16 [1] : vector<8x8xf32> to vector<8xf32>
    %38 = vector.shape_cast %37 : vector<8xf32> to vector<8x1xf32>
    %39 = vector.broadcast %38 : vector<8x1xf32> to vector<8x8xf32>
    %40 = arith.subf %36, %39 : vector<8x8xf32>
    %41 = math.exp %40 : vector<8x8xf32>
    %cst_17 = arith.constant dense<0.000000e+00> : vector<8xf32>
    %42 = vector.multi_reduction <add>, %41, %cst_17 [1] : vector<8x8xf32> to vector<8xf32>
    %43 = vector.shape_cast %42 : vector<8xf32> to vector<8x1xf32>
    %cst_18 = arith.constant dense<0.000000e+00> : vector<8x8xf32>
    %44 = tpu.matmul %41, %35, %cst_18 {dimension_numbers = #tpu.dot_dimension_numbers<[1], [0], [0], [1], [0, 0, 1, 1], [], []>} : vector<8x8xf32>, vector<8x8xf32>, vector<8x8xf32> -> vector<8x8xf32>
    %45 = tpu.reciprocal %43 : vector<8x1xf32> -> vector<8x1xf32>
    %46 = vector.broadcast %45 : vector<8x1xf32> to vector<8x8xf32>
    %47 = arith.mulf %44, %46 : vector<8x8xf32>
    %48 = vector.extract_strided_slice %11 {offsets = [0, 16], sizes = [8, 8], strides = [1, 1]} : vector<8x32xf32> to vector<8x8xf32>
    %49 = vector.extract_strided_slice %14 {offsets = [0, 16], sizes = [8, 8], strides = [1, 1]} : vector<8x32xf32> to vector<8x8xf32>
    %50 = vector.extract_strided_slice %17 {offsets = [0, 16], sizes = [8, 8], strides = [1, 1]} : vector<8x32xf32> to vector<8x8xf32>
    %cst_19 = arith.constant dense<0.000000e+00> : vector<8x8xf32>
    %51 = tpu.matmul %48, %49, %cst_19 {dimension_numbers = #tpu.dot_dimension_numbers<[1], [1], [0], [0], [0, 0, 1, 0], [], []>} : vector<8x8xf32>, vector<8x8xf32>, vector<8x8xf32> -> vector<8x8xf32>
    %cst_20 = arith.constant dense<0xFF800000> : vector<8xf32>
    %52 = vector.multi_reduction <maximumf>, %51, %cst_20 [1] : vector<8x8xf32> to vector<8xf32>
    %53 = vector.shape_cast %52 : vector<8xf32> to vector<8x1xf32>
    %54 = vector.broadcast %53 : vector<8x1xf32> to vector<8x8xf32>
    %55 = arith.subf %51, %54 : vector<8x8xf32>
    %56 = math.exp %55 : vector<8x8xf32>
    %cst_21 = arith.constant dense<0.000000e+00> : vector<8xf32>
    %57 = vector.multi_reduction <add>, %56, %cst_21 [1] : vector<8x8xf32> to vector<8xf32>
    %58 = vector.shape_cast %57 : vector<8xf32> to vector<8x1xf32>
    %cst_22 = arith.constant dense<0.000000e+00> : vector<8x8xf32>
    %59 = tpu.matmul %56, %50, %cst_22 {dimension_numbers = #tpu.dot_dimension_numbers<[1], [0], [0], [1], [0, 0, 1, 1], [], []>} : vector<8x8xf32>, vector<8x8xf32>, vector<8x8xf32> -> vector<8x8xf32>
    %60 = tpu.reciprocal %58 : vector<8x1xf32> -> vector<8x1xf32>
    %61 = vector.broadcast %60 : vector<8x1xf32> to vector<8x8xf32>
    %62 = arith.mulf %59, %61 : vector<8x8xf32>
    %63 = vector.extract_strided_slice %11 {offsets = [0, 24], sizes = [8, 8], strides = [1, 1]} : vector<8x32xf32> to vector<8x8xf32>
    %64 = vector.extract_strided_slice %14 {offsets = [0, 24], sizes = [8, 8], strides = [1, 1]} : vector<8x32xf32> to vector<8x8xf32>
    %65 = vector.extract_strided_slice %17 {offsets = [0, 24], sizes = [8, 8], strides = [1, 1]} : vector<8x32xf32> to vector<8x8xf32>
    %cst_23 = arith.constant dense<0.000000e+00> : vector<8x8xf32>
    %66 = tpu.matmul %63, %64, %cst_23 {dimension_numbers = #tpu.dot_dimension_numbers<[1], [1], [0], [0], [0, 0, 1, 0], [], []>} : vector<8x8xf32>, vector<8x8xf32>, vector<8x8xf32> -> vector<8x8xf32>
    %cst_24 = arith.constant dense<0xFF800000> : vector<8xf32>
    %67 = vector.multi_reduction <maximumf>, %66, %cst_24 [1] : vector<8x8xf32> to vector<8xf32>
    %68 = vector.shape_cast %67 : vector<8xf32> to vector<8x1xf32>
    %69 = vector.broadcast %68 : vector<8x1xf32> to vector<8x8xf32>
    %70 = arith.subf %66, %69 : vector<8x8xf32>
    %71 = math.exp %70 : vector<8x8xf32>
    %cst_25 = arith.constant dense<0.000000e+00> : vector<8xf32>
    %72 = vector.multi_reduction <add>, %71, %cst_25 [1] : vector<8x8xf32> to vector<8xf32>
    %73 = vector.shape_cast %72 : vector<8xf32> to vector<8x1xf32>
    %cst_26 = arith.constant dense<0.000000e+00> : vector<8x8xf32>
    %74 = tpu.matmul %71, %65, %cst_26 {dimension_numbers = #tpu.dot_dimension_numbers<[1], [0], [0], [1], [0, 0, 1, 1], [], []>} : vector<8x8xf32>, vector<8x8xf32>, vector<8x8xf32> -> vector<8x8xf32>
    %75 = tpu.reciprocal %73 : vector<8x1xf32> -> vector<8x1xf32>
    %76 = vector.broadcast %75 : vector<8x1xf32> to vector<8x8xf32>
    %77 = arith.mulf %74, %76 : vector<8x8xf32>
    %78 = tpu.concatenate %32, %47, %62, %77 in 1 : vector<8x8xf32>, vector<8x8xf32>, vector<8x8xf32>, vector<8x8xf32> -> vector<8x32xf32>
    %c0_27 = arith.constant 0 : index
    %c0_28 = arith.constant 0 : index
    %79 = vector.load %arg11[%c0_27, %c0_28] : memref<8x32xf32, #tpu.memory_space<vmem>>, vector<8x32xf32>
    %80 = arith.index_cast %arg2 : i32 to index
    %c0_29 = arith.constant 0 : index
    %c0_30 = arith.constant 0 : index
    %81 = vector.load %arg9[%80, %c0_29, %c0_30] : memref<1x32x32xf32, #tpu.memory_space<vmem>>, vector<1x32x32xf32>
    %82 = vector.shape_cast %81 : vector<1x32x32xf32> to vector<32x32xf32>
    %cst_31 = arith.constant dense<0.000000e+00> : vector<8x32xf32>
    %83 = tpu.matmul %78, %82, %cst_31 {dimension_numbers = #tpu.dot_dimension_numbers<[1], [0], [0], [1], [0, 0, 1, 1], [], []>} : vector<8x32xf32>, vector<32x32xf32>, vector<8x32xf32> -> vector<8x32xf32>
    %84 = arith.addf %79, %83 : vector<8x32xf32>
    %c0_32 = arith.constant 0 : index
    %c0_33 = arith.constant 0 : index
    %85 = vector.load %arg11[%c0_32, %c0_33] : memref<8x32xf32, #tpu.memory_space<vmem>>, vector<8x32xf32>
    tpu.vector_store %arg11[%c0_32, %c0_33], %84 {strides = array<i32>} : memref<8x32xf32, #tpu.memory_space<vmem>>, vector<8x32xf32>,
    %c0_i32_34 = arith.constant 0 : i32
    %86 = arith.cmpi eq, %arg2, %c0_i32_34 : i32
    %87 = arith.extui %86 : i1 to i32
    %c0_i32_35 = arith.constant 0 : i32
    %88 = arith.cmpi ne, %87, %c0_i32_35 : i32
    scf.if %88 {
      %c0_36 = arith.constant 0 : index
      %c0_37 = arith.constant 0 : index
      %89 = vector.load %arg11[%c0_36, %c0_37] : memref<8x32xf32, #tpu.memory_space<vmem>>, vector<8x32xf32>
      %c0_38 = arith.constant 0 : index
      %c0_39 = arith.constant 0 : index
      %c0_40 = arith.constant 0 : index
      %90 = vector.load %arg10[%c0_38, %c0_39, %c0_40] : memref<1x8x32xf32, #tpu.memory_space<vmem>>, vector<1x8x32xf32>
      %91 = vector.shape_cast %90 : vector<1x8x32xf32> to vector<8x32xf32>
      %92 = vector.shape_cast %89 : vector<8x32xf32> to vector<1x8x32xf32>
      tpu.vector_store %arg10[%c0_38, %c0_39, %c0_40], %92 {strides = array<i32>} : memref<1x8x32xf32, #tpu.memory_space<vmem>>, vector<1x8x32xf32>,
    } else {
    }
    return
  }
  func.func @transform_0(%arg0: i32, %arg1: i32, %arg2: i32) -> (i32, i32, i32) {
    %c0_i32 = arith.constant 0 : i32
    %c0_i32_0 = arith.constant 0 : i32
    return %arg0, %arg1, %c0_i32 : i32, i32, i32
  }
  func.func @transform_1(%arg0: i32, %arg1: i32, %arg2: i32) -> (i32, i32, i32) {
    %c0_i32 = arith.constant 0 : i32
    %c0_i32_0 = arith.constant 0 : i32
    %c0_i32_1 = arith.constant 0 : i32
    return %arg0, %c0_i32, %c0_i32_0 : i32, i32, i32
  }
  func.func @transform_2(%arg0: i32, %arg1: i32, %arg2: i32) -> (i32, i32, i32) {
    %c0_i32 = arith.constant 0 : i32
    %c0_i32_0 = arith.constant 0 : i32
    %c0_i32_1 = arith.constant 0 : i32
    return %arg0, %c0_i32, %c0_i32_0 : i32, i32, i32
  }
  func.func @transform_3(%arg0: i32, %arg1: i32, %arg2: i32) -> (i32, i32, i32) {
    %c0_i32 = arith.constant 0 : i32
    %c0_i32_0 = arith.constant 0 : i32
    %c0_i32_1 = arith.constant 0 : i32
    %c0_i32_2 = arith.constant 0 : i32
    return %c0_i32, %c0_i32_0, %c0_i32_1 : i32, i32, i32
  }
  func.func @transform_4(%arg0: i32, %arg1: i32, %arg2: i32) -> (i32, i32, i32) {
    %c0_i32 = arith.constant 0 : i32
    %c0_i32_0 = arith.constant 0 : i32
    %c0_i32_1 = arith.constant 0 : i32
    %c0_i32_2 = arith.constant 0 : i32
    return %c0_i32, %c0_i32_0, %c0_i32_1 : i32, i32, i32
  }
  func.func @transform_5(%arg0: i32, %arg1: i32, %arg2: i32) -> (i32, i32, i32) {
    %c0_i32 = arith.constant 0 : i32
    %c0_i32_0 = arith.constant 0 : i32
    %c0_i32_1 = arith.constant 0 : i32
    %c0_i32_2 = arith.constant 0 : i32
    return %c0_i32, %c0_i32_0, %c0_i32_1 : i32, i32, i32
  }
  func.func @transform_6(%arg0: i32, %arg1: i32, %arg2: i32) -> (i32, i32, i32) {
    %c0_i32 = arith.constant 0 : i32
    %c0_i32_0 = arith.constant 0 : i32
    %c0_i32_1 = arith.constant 0 : i32
    %c0_i32_2 = arith.constant 0 : i32
    return %c0_i32, %c0_i32_0, %c0_i32_1 : i32, i32, i32
  }
  func.func @transform_7(%arg0: i32, %arg1: i32, %arg2: i32) -> (i32, i32, i32) {
    %c0_i32 = arith.constant 0 : i32
    %c0_i32_0 = arith.constant 0 : i32
    return %arg0, %arg1, %c0_i32 : i32, i32, i32
  }
}

module attributes {stable_mosaic.version = 11 : i64} {
  func.func @_multihead_kernel(%arg0: i32, %arg1: i32, %arg2: i32, %arg3: memref<1x8x32xf32, #tpu.memory_space<vmem>>, %arg4: memref<1x8x32xf32, #tpu.memory_space<vmem>>, %arg5: memref<1x8x32xf32, #tpu.memory_space<vmem>>, %arg6: memref<1x32x32xf32, #tpu.memory_space<vmem>>, %arg7: memref<1x32x32xf32, #tpu.memory_space<vmem>>, %arg8: memref<1x32x32xf32, #tpu.memory_space<vmem>>, %arg9: memref<1x32x32xf32, #tpu.memory_space<vmem>>, %arg10: memref<1x8x32xf32, #tpu.memory_space<vmem>>, %arg11: memref<8x32xf32, #tpu.memory_space<vmem>>, %arg12: memref<1x8x32xf32, #tpu.memory_space<vmem>>, %arg13: memref<1x8x32xf32, #tpu.memory_space<vmem>>) attributes {dimension_semantics = [#tpu.dimension_semantics<parallel>, #tpu.dimension_semantics<arbitrary>, #tpu.dimension_semantics<arbitrary>], iteration_bounds = array<i64: 2, 1, 1>, scalar_prefetch = 0 : i64, scratch_operands = 3 : i64, tpu.core_type = #tpu.core_type<tc>, window_params = [{transform_indices = @transform_0, window_bounds = array<i64: 1, 8, 32>}, {transform_indices = @transform_1, window_bounds = array<i64: 1, 8, 32>}, {transform_indices = @transform_2, window_bounds = array<i64: 1, 8, 32>}, {pipeline_mode = #tpu.pipeline_mode<synchronous>, transform_indices = @transform_3, window_bounds = array<i64: 1, 32, 32>}, {pipeline_mode = #tpu.pipeline_mode<synchronous>, transform_indices = @transform_4, window_bounds = array<i64: 1, 32, 32>}, {pipeline_mode = #tpu.pipeline_mode<synchronous>, transform_indices = @transform_5, window_bounds = array<i64: 1, 32, 32>}, {pipeline_mode = #tpu.pipeline_mode<synchronous>, transform_indices = @transform_6, window_bounds = array<i64: 1, 32, 32>}, {transform_indices = @transform_7, window_bounds = array<i64: 1, 8, 32>}]} {
    %c0_i32 = arith.constant 0 : i32
    %0 = arith.cmpi eq, %arg2, %c0_i32 : i32
    %1 = arith.extui %0 : i1 to i32
    %c0_i32_0 = arith.constant 0 : i32
    %2 = arith.cmpi ne, %1, %c0_i32_0 : i32
    scf.if %2 {
      %cst_36 = arith.constant 0.000000e+00 : f32
      %89 = vector.broadcast %cst_36 : f32 to vector<8x32xf32>
      %c0_37 = arith.constant 0 : index
      %c0_38 = arith.constant 0 : index
      %90 = vector.load %arg11[%c0_37, %c0_38] : memref<8x32xf32, #tpu.memory_space<vmem>>, vector<8x32xf32>
      tpu.vector_store %arg11[%c0_37, %c0_38], %89 {strides = array<i32>} : memref<8x32xf32, #tpu.memory_space<vmem>>, vector<8x32xf32>,
    } else {
    }
    %c0_i32_1 = arith.constant 0 : i32
    %3 = arith.cmpi eq, %arg1, %c0_i32_1 : i32
    %4 = arith.extui %3 : i1 to i32
    %c0_i32_2 = arith.constant 0 : i32
    %5 = arith.cmpi ne, %4, %c0_i32_2 : i32
    scf.if %5 {
      %c0_36 = arith.constant 0 : index
      %c0_37 = arith.constant 0 : index
      %c0_38 = arith.constant 0 : index
      %89 = vector.load %arg4[%c0_36, %c0_37, %c0_38] : memref<1x8x32xf32, #tpu.memory_space<vmem>>, vector<1x8x32xf32>
      %90 = vector.shape_cast %89 : vector<1x8x32xf32> to vector<8x32xf32>
      %c0_39 = arith.constant 0 : index
      %c0_40 = arith.constant 0 : index
      %c0_41 = arith.constant 0 : index
      %91 = vector.load %arg5[%c0_39, %c0_40, %c0_41] : memref<1x8x32xf32, #tpu.memory_space<vmem>>, vector<1x8x32xf32>
      %92 = vector.shape_cast %91 : vector<1x8x32xf32> to vector<8x32xf32>
      %93 = arith.index_cast %arg2 : i32 to index
      %c0_42 = arith.constant 0 : index
      %c0_43 = arith.constant 0 : index
      %94 = vector.load %arg7[%93, %c0_42, %c0_43] : memref<1x32x32xf32, #tpu.memory_space<vmem>>, vector<1x32x32xf32>
      %95 = vector.shape_cast %94 : vector<1x32x32xf32> to vector<32x32xf32>
      %cst_44 = arith.constant dense<0.000000e+00> : vector<8x32xf32>
      %96 = tpu.matmul %90, %95, %cst_44 {dimension_numbers = #tpu.dot_dimension_numbers<[1], [0], [0], [1], [0, 0, 1, 1], [], []>} : vector<8x32xf32>, vector<32x32xf32>, vector<8x32xf32> -> vector<8x32xf32>
      %97 = arith.index_cast %arg2 : i32 to index
      %c0_45 = arith.constant 0 : index
      %c0_46 = arith.constant 0 : index
      %98 = vector.load %arg12[%97, %c0_45, %c0_46] : memref<1x8x32xf32, #tpu.memory_space<vmem>>, vector<1x8x32xf32>
      %99 = vector.shape_cast %98 : vector<1x8x32xf32> to vector<8x32xf32>
      %100 = vector.shape_cast %96 : vector<8x32xf32> to vector<1x8x32xf32>
      tpu.vector_store %arg12[%97, %c0_45, %c0_46], %100 {strides = array<i32>} : memref<1x8x32xf32, #tpu.memory_space<vmem>>, vector<1x8x32xf32>,
      %101 = arith.index_cast %arg2 : i32 to index
      %c0_47 = arith.constant 0 : index
      %c0_48 = arith.constant 0 : index
      %102 = vector.load %arg8[%101, %c0_47, %c0_48] : memref<1x32x32xf32, #tpu.memory_space<vmem>>, vector<1x32x32xf32>
      %103 = vector.shape_cast %102 : vector<1x32x32xf32> to vector<32x32xf32>
      %cst_49 = arith.constant dense<0.000000e+00> : vector<8x32xf32>
      %104 = tpu.matmul %92, %103, %cst_49 {dimension_numbers = #tpu.dot_dimension_numbers<[1], [0], [0], [1], [0, 0, 1, 1], [], []>} : vector<8x32xf32>, vector<32x32xf32>, vector<8x32xf32> -> vector<8x32xf32>
      %105 = arith.index_cast %arg2 : i32 to index
      %c0_50 = arith.constant 0 : index
      %c0_51 = arith.constant 0 : index
      %106 = vector.load %arg13[%105, %c0_50, %c0_51] : memref<1x8x32xf32, #tpu.memory_space<vmem>>, vector<1x8x32xf32>
      %107 = vector.shape_cast %106 : vector<1x8x32xf32> to vector<8x32xf32>
      %108 = vector.shape_cast %104 : vector<8x32xf32> to vector<1x8x32xf32>
      tpu.vector_store %arg13[%105, %c0_50, %c0_51], %108 {strides = array<i32>} : memref<1x8x32xf32, #tpu.memory_space<vmem>>, vector<1x8x32xf32>,
    } else {
    }
    %c0 = arith.constant 0 : index
    %c0_3 = arith.constant 0 : index
    %c0_4 = arith.constant 0 : index
    %6 = vector.load %arg3[%c0, %c0_3, %c0_4] : memref<1x8x32xf32, #tpu.memory_space<vmem>>, vector<1x8x32xf32>
    %7 = vector.shape_cast %6 : vector<1x8x32xf32> to vector<8x32xf32>
    %8 = arith.index_cast %arg2 : i32 to index
    %c0_5 = arith.constant 0 : index
    %c0_6 = arith.constant 0 : index
    %9 = vector.load %arg6[%8, %c0_5, %c0_6] : memref<1x32x32xf32, #tpu.memory_space<vmem>>, vector<1x32x32xf32>
    %10 = vector.shape_cast %9 : vector<1x32x32xf32> to vector<32x32xf32>
    %cst = arith.constant dense<0.000000e+00> : vector<8x32xf32>
    %11 = tpu.matmul %7, %10, %cst {dimension_numbers = #tpu.dot_dimension_numbers<[1], [0], [0], [1], [0, 0, 1, 1], [], []>} : vector<8x32xf32>, vector<32x32xf32>, vector<8x32xf32> -> vector<8x32xf32>
    %12 = arith.index_cast %arg2 : i32 to index
    %c0_7 = arith.constant 0 : index
    %c0_8 = arith.constant 0 : index
    %13 = vector.load %arg12[%12, %c0_7, %c0_8] : memref<1x8x32xf32, #tpu.memory_space<vmem>>, vector<1x8x32xf32>
    %14 = vector.shape_cast %13 : vector<1x8x32xf32> to vector<8x32xf32>
    %15 = arith.index_cast %arg2 : i32 to index
    %c0_9 = arith.constant 0 : index
    %c0_10 = arith.constant 0 : index
    %16 = vector.load %arg13[%15, %c0_9, %c0_10] : memref<1x8x32xf32, #tpu.memory_space<vmem>>, vector<1x8x32xf32>
    %17 = vector.shape_cast %16 : vector<1x8x32xf32> to vector<8x32xf32>
    %18 = vector.extract_strided_slice %11 {offsets = [0, 0], sizes = [8, 8], strides = [1, 1]} : vector<8x32xf32> to vector<8x8xf32>
    %19 = vector.extract_strided_slice %14 {offsets = [0, 0], sizes = [8, 8], strides = [1, 1]} : vector<8x32xf32> to vector<8x8xf32>
    %20 = vector.extract_strided_slice %17 {offsets = [0, 0], sizes = [8, 8], strides = [1, 1]} : vector<8x32xf32> to vector<8x8xf32>
    %cst_11 = arith.constant dense<0.000000e+00> : vector<8x8xf32>
    %21 = tpu.matmul %18, %19, %cst_11 {dimension_numbers = #tpu.dot_dimension_numbers<[1], [1], [0], [0], [0, 0, 1, 0], [], []>} : vector<8x8xf32>, vector<8x8xf32>, vector<8x8xf32> -> vector<8x8xf32>
    %cst_12 = arith.constant dense<0xFF800000> : vector<8xf32>
    %22 = vector.multi_reduction <maximumf>, %21, %cst_12 [1] : vector<8x8xf32> to vector<8xf32>
    %23 = vector.shape_cast %22 : vector<8xf32> to vector<8x1xf32>
    %24 = vector.broadcast %23 : vector<8x1xf32> to vector<8x8xf32>
    %25 = arith.subf %21, %24 : vector<8x8xf32>
    %26 = math.exp %25 : vector<8x8xf32>
    %cst_13 = arith.constant dense<0.000000e+00> : vector<8xf32>
    %27 = vector.multi_reduction <add>, %26, %cst_13 [1] : vector<8x8xf32> to vector<8xf32>
    %28 = vector.shape_cast %27 : vector<8xf32> to vector<8x1xf32>
    %cst_14 = arith.constant dense<0.000000e+00> : vector<8x8xf32>
    %29 = tpu.matmul %26, %20, %cst_14 {dimension_numbers = #tpu.dot_dimension_numbers<[1], [0], [0], [1], [0, 0, 1, 1], [], []>} : vector<8x8xf32>, vector<8x8xf32>, vector<8x8xf32> -> vector<8x8xf32>
    %30 = tpu.reciprocal %28 : vector<8x1xf32> -> vector<8x1xf32>
    %31 = vector.broadcast %30 : vector<8x1xf32> to vector<8x8xf32>
    %32 = arith.mulf %29, %31 : vector<8x8xf32>
    %33 = vector.extract_strided_slice %11 {offsets = [0, 8], sizes = [8, 8], strides = [1, 1]} : vector<8x32xf32> to vector<8x8xf32>
    %34 = vector.extract_strided_slice %14 {offsets = [0, 8], sizes = [8, 8], strides = [1, 1]} : vector<8x32xf32> to vector<8x8xf32>
    %35 = vector.extract_strided_slice %17 {offsets = [0, 8], sizes = [8, 8], strides = [1, 1]} : vector<8x32xf32> to vector<8x8xf32>
    %cst_15 = arith.constant dense<0.000000e+00> : vector<8x8xf32>
    %36 = tpu.matmul %33, %34, %cst_15 {dimension_numbers = #tpu.dot_dimension_numbers<[1], [1], [0], [0], [0, 0, 1, 0], [], []>} : vector<8x8xf32>, vector<8x8xf32>, vector<8x8xf32> -> vector<8x8xf32>
    %cst_16 = arith.constant dense<0xFF800000> : vector<8xf32>
    %37 = vector.multi_reduction <maximumf>, %36, %cst_16 [1] : vector<8x8xf32> to vector<8xf32>
    %38 = vector.shape_cast %37 : vector<8xf32> to vector<8x1xf32>
    %39 = vector.broadcast %38 : vector<8x1xf32> to vector<8x8xf32>
    %40 = arith.subf %36, %39 : vector<8x8xf32>
    %41 = math.exp %40 : vector<8x8xf32>
    %cst_17 = arith.constant dense<0.000000e+00> : vector<8xf32>
    %42 = vector.multi_reduction <add>, %41, %cst_17 [1] : vector<8x8xf32> to vector<8xf32>
    %43 = vector.shape_cast %42 : vector<8xf32> to vector<8x1xf32>
    %cst_18 = arith.constant dense<0.000000e+00> : vector<8x8xf32>
    %44 = tpu.matmul %41, %35, %cst_18 {dimension_numbers = #tpu.dot_dimension_numbers<[1], [0], [0], [1], [0, 0, 1, 1], [], []>} : vector<8x8xf32>, vector<8x8xf32>, vector<8x8xf32> -> vector<8x8xf32>
    %45 = tpu.reciprocal %43 : vector<8x1xf32> -> vector<8x1xf32>
    %46 = vector.broadcast %45 : vector<8x1xf32> to vector<8x8xf32>
    %47 = arith.mulf %44, %46 : vector<8x8xf32>
    %48 = vector.extract_strided_slice %11 {offsets = [0, 16], sizes = [8, 8], strides = [1, 1]} : vector<8x32xf32> to vector<8x8xf32>
    %49 = vector.extract_strided_slice %14 {offsets = [0, 16], sizes = [8, 8], strides = [1, 1]} : vector<8x32xf32> to vector<8x8xf32>
    %50 = vector.extract_strided_slice %17 {offsets = [0, 16], sizes = [8, 8], strides = [1, 1]} : vector<8x32xf32> to vector<8x8xf32>
    %cst_19 = arith.constant dense<0.000000e+00> : vector<8x8xf32>
    %51 = tpu.matmul %48, %49, %cst_19 {dimension_numbers = #tpu.dot_dimension_numbers<[1], [1], [0], [0], [0, 0, 1, 0], [], []>} : vector<8x8xf32>, vector<8x8xf32>, vector<8x8xf32> -> vector<8x8xf32>
    %cst_20 = arith.constant dense<0xFF800000> : vector<8xf32>
    %52 = vector.multi_reduction <maximumf>, %51, %cst_20 [1] : vector<8x8xf32> to vector<8xf32>
    %53 = vector.shape_cast %52 : vector<8xf32> to vector<8x1xf32>
    %54 = vector.broadcast %53 : vector<8x1xf32> to vector<8x8xf32>
    %55 = arith.subf %51, %54 : vector<8x8xf32>
    %56 = math.exp %55 : vector<8x8xf32>
    %cst_21 = arith.constant dense<0.000000e+00> : vector<8xf32>
    %57 = vector.multi_reduction <add>, %56, %cst_21 [1] : vector<8x8xf32> to vector<8xf32>
    %58 = vector.shape_cast %57 : vector<8xf32> to vector<8x1xf32>
    %cst_22 = arith.constant dense<0.000000e+00> : vector<8x8xf32>
    %59 = tpu.matmul %56, %50, %cst_22 {dimension_numbers = #tpu.dot_dimension_numbers<[1], [0], [0], [1], [0, 0, 1, 1], [], []>} : vector<8x8xf32>, vector<8x8xf32>, vector<8x8xf32> -> vector<8x8xf32>
    %60 = tpu.reciprocal %58 : vector<8x1xf32> -> vector<8x1xf32>
    %61 = vector.broadcast %60 : vector<8x1xf32> to vector<8x8xf32>
    %62 = arith.mulf %59, %61 : vector<8x8xf32>
    %63 = vector.extract_strided_slice %11 {offsets = [0, 24], sizes = [8, 8], strides = [1, 1]} : vector<8x32xf32> to vector<8x8xf32>
    %64 = vector.extract_strided_slice %14 {offsets = [0, 24], sizes = [8, 8], strides = [1, 1]} : vector<8x32xf32> to vector<8x8xf32>
    %65 = vector.extract_strided_slice %17 {offsets = [0, 24], sizes = [8, 8], strides = [1, 1]} : vector<8x32xf32> to vector<8x8xf32>
    %cst_23 = arith.constant dense<0.000000e+00> : vector<8x8xf32>
    %66 = tpu.matmul %63, %64, %cst_23 {dimension_numbers = #tpu.dot_dimension_numbers<[1], [1], [0], [0], [0, 0, 1, 0], [], []>} : vector<8x8xf32>, vector<8x8xf32>, vector<8x8xf32> -> vector<8x8xf32>
    %cst_24 = arith.constant dense<0xFF800000> : vector<8xf32>
    %67 = vector.multi_reduction <maximumf>, %66, %cst_24 [1] : vector<8x8xf32> to vector<8xf32>
    %68 = vector.shape_cast %67 : vector<8xf32> to vector<8x1xf32>
    %69 = vector.broadcast %68 : vector<8x1xf32> to vector<8x8xf32>
    %70 = arith.subf %66, %69 : vector<8x8xf32>
    %71 = math.exp %70 : vector<8x8xf32>
    %cst_25 = arith.constant dense<0.000000e+00> : vector<8xf32>
    %72 = vector.multi_reduction <add>, %71, %cst_25 [1] : vector<8x8xf32> to vector<8xf32>
    %73 = vector.shape_cast %72 : vector<8xf32> to vector<8x1xf32>
    %cst_26 = arith.constant dense<0.000000e+00> : vector<8x8xf32>
    %74 = tpu.matmul %71, %65, %cst_26 {dimension_numbers = #tpu.dot_dimension_numbers<[1], [0], [0], [1], [0, 0, 1, 1], [], []>} : vector<8x8xf32>, vector<8x8xf32>, vector<8x8xf32> -> vector<8x8xf32>
    %75 = tpu.reciprocal %73 : vector<8x1xf32> -> vector<8x1xf32>
    %76 = vector.broadcast %75 : vector<8x1xf32> to vector<8x8xf32>
    %77 = arith.mulf %74, %76 : vector<8x8xf32>
    %78 = tpu.concatenate %32, %47, %62, %77 in 1 : vector<8x8xf32>, vector<8x8xf32>, vector<8x8xf32>, vector<8x8xf32> -> vector<8x32xf32>
    %c0_27 = arith.constant 0 : index
    %c0_28 = arith.constant 0 : index
    %79 = vector.load %arg11[%c0_27, %c0_28] : memref<8x32xf32, #tpu.memory_space<vmem>>, vector<8x32xf32>
    %80 = arith.index_cast %arg2 : i32 to index
    %c0_29 = arith.constant 0 : index
    %c0_30 = arith.constant 0 : index
    %81 = vector.load %arg9[%80, %c0_29, %c0_30] : memref<1x32x32xf32, #tpu.memory_space<vmem>>, vector<1x32x32xf32>
    %82 = vector.shape_cast %81 : vector<1x32x32xf32> to vector<32x32xf32>
    %cst_31 = arith.constant dense<0.000000e+00> : vector<8x32xf32>
    %83 = tpu.matmul %78, %82, %cst_31 {dimension_numbers = #tpu.dot_dimension_numbers<[1], [0], [0], [1], [0, 0, 1, 1], [], []>} : vector<8x32xf32>, vector<32x32xf32>, vector<8x32xf32> -> vector<8x32xf32>
    %84 = arith.addf %79, %83 : vector<8x32xf32>
    %c0_32 = arith.constant 0 : index
    %c0_33 = arith.constant 0 : index
    %85 = vector.load %arg11[%c0_32, %c0_33] : memref<8x32xf32, #tpu.memory_space<vmem>>, vector<8x32xf32>
    tpu.vector_store %arg11[%c0_32, %c0_33], %84 {strides = array<i32>} : memref<8x32xf32, #tpu.memory_space<vmem>>, vector<8x32xf32>,
    %c0_i32_34 = arith.constant 0 : i32
    %86 = arith.cmpi eq, %arg2, %c0_i32_34 : i32
    %87 = arith.extui %86 : i1 to i32
    %c0_i32_35 = arith.constant 0 : i32
    %88 = arith.cmpi ne, %87, %c0_i32_35 : i32
    scf.if %88 {
      %c0_36 = arith.constant 0 : index
      %c0_37 = arith.constant 0 : index
      %89 = vector.load %arg11[%c0_36, %c0_37] : memref<8x32xf32, #tpu.memory_space<vmem>>, vector<8x32xf32>
      %c0_38 = arith.constant 0 : index
      %c0_39 = arith.constant 0 : index
      %c0_40 = arith.constant 0 : index
      %90 = vector.load %arg10[%c0_38, %c0_39, %c0_40] : memref<1x8x32xf32, #tpu.memory_space<vmem>>, vector<1x8x32xf32>
      %91 = vector.shape_cast %90 : vector<1x8x32xf32> to vector<8x32xf32>
      %92 = vector.shape_cast %89 : vector<8x32xf32> to vector<1x8x32xf32>
      tpu.vector_store %arg10[%c0_38, %c0_39, %c0_40], %92 {strides = array<i32>} : memref<1x8x32xf32, #tpu.memory_space<vmem>>, vector<1x8x32xf32>,
    } else {
    }
    return
  }
  func.func @transform_0(%arg0: i32, %arg1: i32, %arg2: i32) -> (i32, i32, i32) {
    %c0_i32 = arith.constant 0 : i32
    %c0_i32_0 = arith.constant 0 : i32
    return %arg0, %arg1, %c0_i32 : i32, i32, i32
  }
  func.func @transform_1(%arg0: i32, %arg1: i32, %arg2: i32) -> (i32, i32, i32) {
    %c0_i32 = arith.constant 0 : i32
    %c0_i32_0 = arith.constant 0 : i32
    %c0_i32_1 = arith.constant 0 : i32
    return %arg0, %c0_i32, %c0_i32_0 : i32, i32, i32
  }
  func.func @transform_2(%arg0: i32, %arg1: i32, %arg2: i32) -> (i32, i32, i32) {
    %c0_i32 = arith.constant 0 : i32
    %c0_i32_0 = arith.constant 0 : i32
    %c0_i32_1 = arith.constant 0 : i32
    return %arg0, %c0_i32, %c0_i32_0 : i32, i32, i32
  }
  func.func @transform_3(%arg0: i32, %arg1: i32, %arg2: i32) -> (i32, i32, i32) {
    %c0_i32 = arith.constant 0 : i32
    %c0_i32_0 = arith.constant 0 : i32
    %c0_i32_1 = arith.constant 0 : i32
    %c0_i32_2 = arith.constant 0 : i32
    return %c0_i32, %c0_i32_0, %c0_i32_1 : i32, i32, i32
  }
  func.func @transform_4(%arg0: i32, %arg1: i32, %arg2: i32) -> (i32, i32, i32) {
    %c0_i32 = arith.constant 0 : i32
    %c0_i32_0 = arith.constant 0 : i32
    %c0_i32_1 = arith.constant 0 : i32
    %c0_i32_2 = arith.constant 0 : i32
    return %c0_i32, %c0_i32_0, %c0_i32_1 : i32, i32, i32
  }
  func.func @transform_5(%arg0: i32, %arg1: i32, %arg2: i32) -> (i32, i32, i32) {
    %c0_i32 = arith.constant 0 : i32
    %c0_i32_0 = arith.constant 0 : i32
    %c0_i32_1 = arith.constant 0 : i32
    %c0_i32_2 = arith.constant 0 : i32
    return %c0_i32, %c0_i32_0, %c0_i32_1 : i32, i32, i32
  }
  func.func @transform_6(%arg0: i32, %arg1: i32, %arg2: i32) -> (i32, i32, i32) {
    %c0_i32 = arith.constant 0 : i32
    %c0_i32_0 = arith.constant 0 : i32
    %c0_i32_1 = arith.constant 0 : i32
    %c0_i32_2 = arith.constant 0 : i32
    return %c0_i32, %c0_i32_0, %c0_i32_1 : i32, i32, i32
  }
  func.func @transform_7(%arg0: i32, %arg1: i32, %arg2: i32) -> (i32, i32, i32) {
    %c0_i32 = arith.constant 0 : i32
    %c0_i32_0 = arith.constant 0 : i32
    return %arg0, %arg1, %c0_i32 : i32, i32, i32
  }
}

</mosaic_0001>

<bundles_post_ra>
// kernel: tpu_custom_call.1
= control target key start
LH: loop header
LB: loop body
LE: loop exit
PB: predicated region body
PF: predicated region fallthrough
CT: control target
= control target key end

     0   :  { %s2815_s0 = inlined_call_operand.hbm [shape: f32[2,8,32], index: 0, kind: input, shape index: {}]   ;;  %s2816_s1 = inlined_call_operand.hbm [shape: f32[2,8,32], index: 1, kind: input, shape index: {}]   ;;  %s2817_s2 = inlined_call_operand.hbm [shape: f32[2,8,32], index: 2, kind: input, shape index: {}]   ;;  %s2818_s3 = inlined_call_operand.hbm [shape: f32[1,32,32], index: 3, kind: input, shape index: {}]   ;;  %s2819_s4 = inlined_call_operand.hbm [shape: f32[1,32,32], index: 4, kind: input, shape index: {}]   ;;  %s2820_s5 = inlined_call_operand.hbm [shape: f32[1,32,32], index: 5, kind: input, shape index: {}]   ;;  %s2821_s6 = inlined_call_operand.hbm [shape: f32[1,32,32], index: 6, kind: input, shape index: {}]   ;;  %s2822_s7 = inlined_call_operand.hbm [shape: f32[2,8,32], index: 7, kind: output, shape index: {}]  }
   0x1   :  { %2847 = sst [smem:[#allocation29_spill]] %s2816_s1 }
   0x2   :  { %2848 = sst [smem:[#allocation30_spill]] %s2818_s3 }
   0x3   :  { %2849 = sst [smem:[#allocation31_spill]] %s2820_s5 }
   0x4   :  { %2850 = sst [smem:[#allocation32_spill]] %s2822_s7 }
   0x5   :  { %12 = vsyncpa [#allocation6], 0 }
   0x6   :  { %14 = vsyncpa [#allocation6 + $0x1], 0 }
   0x7   :  { %15 = vsyncpa [#allocation9], 0 }
   0x8   :  { %17 = vsyncpa [#allocation9 + $0x1], 0 }
   0x9   :  { %18 = vsyncpa [#allocation12], 0 }
   0xa   :  { %19 = vsyncpa [#allocation15], 0 }
   0xb   :  { %20 = vsyncpa [#allocation7], 0 }
   0xc   :  { %22 = vsyncpa [#allocation7 + $0x1], 0  ;;  %s2347_s24 = smov 0   ;;  %s2349_s25 = smov 0  }
   0xd   :  { %s2351_s26 = smov 0   ;;  %s2353_s27 = smov 0  }
   0xe   :  { %s2355_s28 = smov 0   ;;  %s2357_s29 = smov 0  }
   0xf LB: > { %2851 = sst [smem:[#allocation23_spill]] %s2266_s24  ;;  %s2378_s30 = sadd.s32 4294967295, %s2286_s29   ;;  %s2286_s29 = sphi %s2357_s29, %s28_s29   ;;  %s2282_s28 = sphi %s2355_s28, %s2892_s28   ;;  %s2278_s27 = sphi %s2353_s27, %s2891_s27   ;;  %s2274_s26 = sphi %s2351_s26, %s2895_s26   ;;  %s2270_s25 = sphi %s2349_s25, %s2894_s25   ;;  %s2266_s24 = sphi %s2347_s24, %s2893_s24  }
  0x10   : > { %2852 = sst [smem:[#allocation24_spill]] %s2282_s28  ;;  %p1665_p0 = scmp.ge.s32.totalorder %s2286_s29, 1 }
  0x11   : > { %2853 = sst [smem:[#allocation25_spill]] %s2286_s29  ;;  %p2832_p1 = scmp.eq.s32.totalorder %s2378_s30, 0 }
  0x12   : > { %p244_p2 = scmp.lt.s32.totalorder %s2286_s29, 3  ;;  %s2288_s9 = smov [#allocation11]  }
  0x13   : > { %s256_s10 = sshll.u32 %s2288_s9, 4  ;;  %s2289_s12 = smov [#allocation14]   ;;  %s2387_s10 = int_to_ptr.vmem [resolvable:$true] %s256_s10 }
  0x14   : > { %p2383_p3 = pnand %p1665_p0, %p244_p2  ;;  %s282_s13 = sshll.u32 %s2289_s12, 4  ;;  %s2398_s13 = int_to_ptr.vmem [resolvable:$true] %s282_s13 }
  0x15   : > { %s2856_s3 = sld [smem:[#allocation30_spill]] }
  0x16   : > { %s2854_s8 = scalar_select %p2383_p3, 1, 0 }
  0x17   : > { %p1874_p4 = pneg %p2383_p3 }
  0x19   : > { %p2394_p6 = pnand %p1874_p4, %p2832_p1 }
  0x1b   : > { %s2855_s11 = scalar_select %p2394_p6, 1, 0 }
  0x1c   : > { %s1990_s16 = scalar_lea.hbm %s2856_s3, 512  ;;  %p2408_p8 = pneg %p2394_p6 }
  0x1d   : > { %p1991_p7 = scmp.ne.s32.totalorder %s2856_s3, %s1990_s16  ;;  %p1997_p11 = scmp.lt.u32.totalorder %s1990_s16, %s2856_s3 }
  0x1e   : > { %s2857_s19 = scalar_select %p2408_p8, 1, 0 }
  0x1f   : > { %p1993_p9 = pnand %p2408_p8, %p1991_p7 }
  0x21   : > { %p1994_p10 = pneg %p1993_p9 }
  0x23   : > { %p1999_p12 = pnand %p1997_p11, %p1994_p10 }
  0x25   : > { %2002 = shalt.err (!%p1999_p12)
}
  0x26   : > { %s2003_s22 = scalar_lea.vmem %s2387_s10, 512  ;;  %p2011_p4 = scmp.lt.s32.totalorder %s2387_s10, %s2387_s10 }
  0x27   : > { %p2004_p13 = scmp.ne.s32.totalorder %s2387_s10, %s2003_s22  ;;  %p2012_p5 = scmp.lt.s32.totalorder %s2003_s22, %s2003_s22 }
  0x29   : > { %p2006_p0 = pnand %p2004_p13, %p2408_p8  ;;  %p2013_p7 = por %p2012_p5, %p2011_p4 }
  0x2b   : > { %p2007_p2 = pneg %p2006_p0 }
  0x2d   : > { %p2014_p9 = pnand %p2013_p7, %p2007_p2 }
  0x2f   : > { %2017 = shalt.err (!%p2014_p9)
}
  0x30   : > { %s2823_s23 = smov 128   ;;  %s2825_s9 = smov 8  }
  0x31   : > { %1877 = dma.hbm_to_vmem [thread:$0]  (!%p2394_p6), %s2856_s3, 512, %s2387_s10, [#allocation12], %s2823_s23, %s2823_s23, %s2825_s9  }
  0x32   : > { %s2858_s5 = sld [smem:[#allocation31_spill]] }
  0x38   : > { %s2018_s17 = scalar_lea.hbm %s2858_s5, 512 }
  0x39   : > { %p2019_p5 = scmp.ne.s32.totalorder %s2858_s5, %s2018_s17  ;;  %p2025_p12 = scmp.lt.u32.totalorder %s2018_s17, %s2858_s5 }
  0x3b   : > { %p2021_p10 = pnand %p2019_p5, %p2408_p8 }
  0x3d   : > { %p2022_p11 = pneg %p2021_p10 }
  0x3f   : > { %p2027_p13 = pnand %p2025_p12, %p2022_p11 }
  0x41   : > { %2030 = shalt.err (!%p2027_p13)
}
  0x42   : > { %s2031_s10 = scalar_lea.vmem %s2398_s13, 512  ;;  %p2039_p7 = scmp.lt.s32.totalorder %s2398_s13, %s2398_s13 }
  0x43   : > { %p2032_p0 = scmp.ne.s32.totalorder %s2398_s13, %s2031_s10  ;;  %p2040_p9 = scmp.lt.s32.totalorder %s2031_s10, %s2031_s10 }
  0x45   : > { %p2034_p2 = pnand %p2032_p0, %p2408_p8  ;;  %p2041_p5 = por %p2040_p9, %p2039_p7 }
  0x47   : > { %p2035_p4 = pneg %p2034_p2 }
  0x49   : > { %p2042_p10 = pnand %p2041_p5, %p2035_p4 }
  0x4b   : > { %2045 = shalt.err (!%p2042_p10)
}
  0x4c   : > { %1883 = dma.hbm_to_vmem [thread:$0]  (!%p2394_p6), %s2858_s5, 512, %s2398_s13, [#allocation15], %s2823_s23, %s2823_s23, %s2825_s9  }
  0x4d   : > { %s1664_s15 = sadd.s32 4294967294, %s2286_s29   ;;  %s47_s16 = sadd.s32 1, %s2282_s28 }
  0x4e   : > { %p49_p11 = scmp.ge.s32.totalorder %s47_s16, 2  ;;  %s56_s17 = sadd.s32 1, %s2274_s26 }
  0x4f   : > { %p63_p12 = scmp.ne.s32.totalorder %s2274_s26, %s2270_s25  ;;  %p64_p13 = scmp.eq.s32.totalorder %s2286_s29, 0 }
  0x50   : > { %s2897_s16 = smov (%p49_p11, %s47_s16), 0  ;;  %p69_p2 = scmp.ne.s32.totalorder %s2270_s25, %s2266_s24 }
  0x51   : > { %2859 = sst [smem:[#allocation26_spill]] %s2897_s16  ;;  %p2466_p0 = por %p64_p13, %p63_p12 }
  0x52   : > { %s51_s13 = ssub.s32 %s2282_s28, %s2897_s16  ;;  %p231_p4 = scmp.eq.s32.totalorder %s2378_s30, 1 }
  0x53   : > { %p54_p7 = scmp.eq.s32.totalorder %s51_s13, 0  ;;  %p2477_p9 = por %p2832_p1, %p69_p2 }
  0x54   : > { %p2481_p5 = por %p231_p4, %p63_p12  ;;  %p237_p10 = scmp.eq.s32.totalorder %s1664_s15, 1 }
  0x55   : > { %s2861_s20 = scalar_select %p2477_p9, 1, 0 }
  0x56   : > { %s2862_s21 = scalar_select %p2481_p5, 1, 0 }
  0x57   : > { %s2486_s22 = scalar_select %p54_p7, %s2274_s26, %s56_s17  }
  0x58   : > { %p2488_p11 = por %p237_p10, %p69_p2  ;;  %p1905_p13 = scmp.lt.s32.totalorder %s2286_s29, 2 }
  0x59   : > { %2863 = sst [smem:[#allocation27_spill]] %s2486_s22  ;;  %s2827_s12 = sand.u32 1, %s2274_s26  }
  0x5a   : > { %s2864_s10 = scalar_select %p2488_p11, 1, 0 }
  0x5b   : > { %s2495_s14 = sshll.u32 %s2282_s28, 7  ;;  %s2499_s13 = sshll.u32 %s2827_s12, 3 }
  0x5c   : > { %2865 = sst [smem:[#allocation28_spill]] %s2864_s10  ;;  %p2503_p12 = pnand %p1905_p13, %p2466_p0 }
  0x5d   : > { %s328_s15 = sand.u32 1, %s2286_s29   ;;  %s2867_s1 = sld [smem:[#allocation29_spill]] }
  0x5e   : > { %s2866_s23 = scalar_select %p2503_p12, 1, 0 }
  0x5f   : > { %s332_s5 = scalar_lea.vmem [#allocation8], %s2499_s13  ;;  %s2517_s18 = scalar_lea.sflag [#allocation9], %s328_s15 }
  0x60   : > { %s339_s12 = sshll.u32 %s332_s5, 4  ;;  %p2523_p2 = pneg %p2503_p12  ;;  %s2515_s12 = int_to_ptr.vmem [resolvable:$true] %s339_s12 }
  0x62   : > { %s2868_s28 = scalar_select %p2523_p2, 1, 0 }
  0x63   : > { %s2512_s3 = scalar_lea.hbm %s2867_s1, %s2495_s14  ;;  %s2051_s22 = scalar_lea.hbm %s2867_s1, 256 }
  0x64   : > { %s2046_s16 = scalar_lea.hbm %s2512_s3, 128  ;;  %p2052_p10 = scmp.lt.u32.totalorder %s2512_s3, %s2867_s1 }
  0x65   : > { %p2047_p0 = scmp.ne.s32.totalorder %s2512_s3, %s2046_s16  ;;  %p2053_p13 = scmp.lt.u32.totalorder %s2051_s22, %s2046_s16 }
  0x66   : > { %p2055_p11 = scmp.lt.u32.totalorder %s2046_s16, %s2512_s3 }
  0x67   : > { %p2049_p4 = pnand %p2523_p2, %p2047_p0  ;;  %p2054_p1 = por %p2053_p13, %p2052_p10 }
  0x69   : > { %p2050_p7 = pneg %p2049_p4  ;;  %p2056_p5 = por %p2055_p11, %p2054_p1 }
  0x6b   : > { %p2057_p9 = pnand %p2056_p5, %p2050_p7 }
  0x6d   : > { %2060 = shalt.err (!%p2057_p9)
}
  0x6e   : > { %s2061_s15 = scalar_lea.vmem %s2515_s12, 128  ;;  %s2292_s9 = smov [#allocation8]  }
  0x6f   : > { %p2062_p0 = scmp.ne.s32.totalorder %s2515_s12, %s2061_s15  ;;  %s2066_s17 = sshll.u32 %s2292_s9, 4  ;;  %s2067_s17 = int_to_ptr.vmem [resolvable:$false] %s2066_s17 }
  0x70   : > { %s2068_s29 = scalar_lea.vmem %s2067_s17, 256  ;;  %p2069_p6 = scmp.lt.s32.totalorder %s2515_s12, %s2067_s17 }
  0x71   : > { %p2064_p4 = pnand %p2062_p0, %p2523_p2  ;;  %p2070_p8 = scmp.lt.s32.totalorder %s2068_s29, %s2061_s15 }
  0x73   : > { %p2065_p3 = pneg %p2064_p4  ;;  %p2071_p10 = por %p2070_p8, %p2069_p6 }
  0x75   : > { %p2072_p13 = pnand %p2071_p10, %p2065_p3 }
  0x77   : > { %2075 = shalt.err (!%p2072_p13)
}
  0x78   : > { %1893 = dma.hbm_to_vmem [thread:$0]  (!%p2503_p12), %s2512_s3, 128, %s2515_s12, %s2517_s18  }
  0x79   : > { %s2293_s16 = smov [#allocation13]   ;;  %s2294_s5 = smov [#allocation16]  }
  0x7a   : > { %s269_s22 = sshll.u32 %s2293_s16, 4  ;;  %s295_s1 = sshll.u32 %s2294_s5, 4  ;;  %s270_s22 = int_to_ptr.vmem [resolvable:$true] %s269_s22  ;;  %s296_s1 = int_to_ptr.vmem [resolvable:$true] %s295_s1 }
  0x7b   : > { %s2076_s17 = scalar_lea.hbm %s2819_s4, 512  ;;  %p2869_p3 = scmp.ne.s32.totalorder %s2857_s19, 0 }
  0x7c   : > { %p2077_p1 = scmp.ne.s32.totalorder %s2819_s4, %s2076_s17  ;;  %p2083_p9 = scmp.lt.u32.totalorder %s2076_s17, %s2819_s4 }
  0x7e   : > { %p2079_p6 = pnand %p2077_p1, %p2869_p3 }
  0x80   : > { %p2080_p8 = pneg %p2079_p6 }
  0x82   : > { %p2085_p5 = pnand %p2083_p9, %p2080_p8 }
  0x84   : > { %2088 = shalt.err (!%p2085_p5)
}
  0x85   : > { %s2089_s3 = scalar_lea.vmem %s270_s22, 512  ;;  %p2097_p4 = scmp.lt.s32.totalorder %s270_s22, %s270_s22 }
  0x86   : > { %p2090_p11 = scmp.ne.s32.totalorder %s270_s22, %s2089_s3  ;;  %p2098_p10 = scmp.lt.s32.totalorder %s2089_s3, %s2089_s3 }
  0x88   : > { %p2092_p7 = pnand %p2090_p11, %p2869_p3  ;;  %p2099_p13 = por %p2098_p10, %p2097_p4 }
  0x8a   : > { %p2093_p0 = pneg %p2092_p7 }
  0x8c   : > { %p2100_p12 = pnand %p2099_p13, %p2093_p0 }
  0x8e   : > { %2103 = shalt.err (!%p2100_p12)
}
  0x8f   : > { %p2870_p1 = scmp.ne.s32.totalorder %s2855_s11, 0  ;;  %s2871_s10 = smov 8  }
  0x90   : > { %s2872_s12 = smov 128   ;;  %s2104_s9 = scalar_lea.hbm %s2821_s6, 512 }
  0x91   : > { %1880 = dma.hbm_to_vmem [thread:$0]  (!%p2870_p1), %s2819_s4, 512, %s270_s22, [#allocation12], %s2872_s12, %s2872_s12, %s2871_s10  }
  0x92   : > { %p2105_p6 = scmp.ne.s32.totalorder %s2821_s6, %s2104_s9  ;;  %p2111_p9 = scmp.lt.u32.totalorder %s2104_s9, %s2821_s6 }
  0x94   : > { %p2107_p12 = pnand %p2105_p6, %p2869_p3 }
  0x96   : > { %p2108_p8 = pneg %p2107_p12 }
  0x98   : > { %p2113_p5 = pnand %p2111_p9, %p2108_p8 }
  0x9a   : > { %2116 = shalt.err (!%p2113_p5)
}
  0x9b   : > { %s2117_s7 = scalar_lea.vmem %s296_s1, 512  ;;  %p2125_p4 = scmp.lt.s32.totalorder %s296_s1, %s296_s1 }
  0x9c   : > { %p2118_p11 = scmp.ne.s32.totalorder %s296_s1, %s2117_s7  ;;  %p2126_p10 = scmp.lt.s32.totalorder %s2117_s7, %s2117_s7 }
  0x9e   : > { %p2120_p7 = pnand %p2118_p11, %p2869_p3  ;;  %p2127_p13 = por %p2126_p10, %p2125_p4 }
  0xa0   : > { %p2121_p0 = pneg %p2120_p7 }
  0xa2   : > { %p2128_p2 = pnand %p2127_p13, %p2121_p0 }
  0xa4   : > { %2131 = shalt.err (!%p2128_p2)
}
  0xa5   : > { %1886 = dma.hbm_to_vmem [thread:$0]  (!%p2870_p1), %s2821_s6, 512, %s296_s1, [#allocation15], %s2872_s12, %s2872_s12, %s2871_s10  }
  0xa6   : > { %s2593_s5 = scalar_lea.hbm %s2815_s0, %s2495_s14  ;;  %s313_s11 = scalar_lea.vmem [#allocation5], %s2499_s13 }
  0xa7   : > { %s321_s9 = sshll.u32 %s313_s11, 4  ;;  %s2602_s29 = scalar_lea.hbm %s2817_s2, %s2495_s14  ;;  %s2596_s9 = int_to_ptr.vmem [resolvable:$true] %s321_s9 }
  0xa8   : > { %s2873_s3 = sand.u32 1, %s2274_s26   ;;  %s2132_s10 = scalar_lea.hbm %s2593_s5, 128 }
  0xa9   : > { %s310_s1 = scalar_lea.sflag [#allocation6], %s2873_s3  ;;  %p2133_p2 = scmp.ne.s32.totalorder %s2593_s5, %s2132_s10 }
  0xaa   : > { %p2874_p3 = scmp.ne.s32.totalorder %s2868_s28, 0  ;;  %s2137_s22 = scalar_lea.hbm %s2815_s0, 256 }
  0xab   : > { %p2138_p12 = scmp.lt.u32.totalorder %s2593_s5, %s2815_s0  ;;  %p2139_p8 = scmp.lt.u32.totalorder %s2137_s22, %s2132_s10 }
  0xac   : > { %p2135_p1 = pnand %p2133_p2, %p2874_p3  ;;  %p2141_p5 = scmp.lt.u32.totalorder %s2132_s10, %s2593_s5 }
  0xad   : > { %p2140_p9 = por %p2139_p8, %p2138_p12 }
  0xae   : > { %p2136_p6 = pneg %p2135_p1 }
  0xaf   : > { %p2142_p11 = por %p2141_p5, %p2140_p9 }
  0xb1   : > { %p2143_p7 = pnand %p2142_p11, %p2136_p6 }
  0xb3   : > { %2146 = shalt.err (!%p2143_p7)
}
  0xb4   : > { %s2147_s14 = scalar_lea.vmem %s2596_s9, 128  ;;  %s2295_s16 = smov [#allocation5]  }
  0xb5   : > { %p2148_p0 = scmp.ne.s32.totalorder %s2596_s9, %s2147_s14  ;;  %s2152_s11 = sshll.u32 %s2295_s16, 4  ;;  %s2153_s11 = int_to_ptr.vmem [resolvable:$false] %s2152_s11 }
  0xb6   : > { %s2154_s17 = scalar_lea.vmem %s2153_s11, 256  ;;  %p2155_p13 = scmp.lt.s32.totalorder %s2596_s9, %s2153_s11 }
  0xb7   : > { %p2150_p4 = pnand %p2148_p0, %p2874_p3  ;;  %p2156_p2 = scmp.lt.s32.totalorder %s2154_s17, %s2147_s14 }
  0xb9   : > { %p2151_p10 = pneg %p2150_p4  ;;  %p2157_p1 = por %p2156_p2, %p2155_p13 }
  0xbb   : > { %p2158_p12 = pnand %p2157_p1, %p2151_p10 }
  0xbd   : > { %2161 = shalt.err (!%p2158_p12)
}
  0xbe   : > { %p2875_p6 = scmp.ne.s32.totalorder %s2866_s23, 0  ;;  %s350_s15 = scalar_lea.vmem [#allocation10], %s2499_s13 }
  0xbf   : > { %s357_s3 = sshll.u32 %s350_s15, 4  ;;  %s2162_s10 = scalar_lea.hbm %s2602_s29, 128  ;;  %s358_s3 = int_to_ptr.vmem [resolvable:$true] %s357_s3 }
  0xc0   : > { %1890 = dma.hbm_to_vmem [thread:$0]  (!%p2875_p6), %s2593_s5, 128, %s2596_s9, %s310_s1  }
  0xc1   : > { %p2163_p8 = scmp.ne.s32.totalorder %s2602_s29, %s2162_s10  ;;  %s2167_s22 = scalar_lea.hbm %s2817_s2, 256 }
  0xc2   : > { %p2168_p11 = scmp.lt.u32.totalorder %s2602_s29, %s2817_s2  ;;  %p2169_p7 = scmp.lt.u32.totalorder %s2167_s22, %s2162_s10 }
  0xc3   : > { %p2165_p9 = pnand %p2163_p8, %p2874_p3  ;;  %p2171_p4 = scmp.lt.u32.totalorder %s2162_s10, %s2602_s29 }
  0xc4   : > { %p2170_p0 = por %p2169_p7, %p2168_p11 }
  0xc5   : > { %p2166_p5 = pneg %p2165_p9 }
  0xc6   : > { %p2172_p10 = por %p2171_p4, %p2170_p0 }
  0xc8   : > { %p2173_p13 = pnand %p2172_p10, %p2166_p5 }
  0xca   : > { %2176 = shalt.err (!%p2173_p13)
}
  0xcb   : > { %s2177_s13 = scalar_lea.vmem %s358_s3, 128  ;;  %s2296_s5 = smov [#allocation10]  }
  0xcc   : > { %p2178_p2 = scmp.ne.s32.totalorder %s358_s3, %s2177_s13  ;;  %s2182_s9 = sshll.u32 %s2296_s5, 4  ;;  %s2183_s9 = int_to_ptr.vmem [resolvable:$false] %s2182_s9 }
  0xcd   : > { %s2184_s1 = scalar_lea.vmem %s2183_s9, 256  ;;  %p2185_p8 = scmp.lt.s32.totalorder %s358_s3, %s2183_s9 }
  0xce   : > { %p2180_p1 = pnand %p2178_p2, %p2874_p3  ;;  %p2186_p9 = scmp.lt.s32.totalorder %s2184_s1, %s2177_s13 }
  0xd0   : > { %p2181_p12 = pneg %p2180_p1  ;;  %p2187_p6 = por %p2186_p9, %p2185_p8 }
  0xd2   : > { %p2188_p7 = pnand %p2187_p6, %p2181_p12 }
  0xd4   : > { %2191 = shalt.err (!%p2188_p7)
}
  0xd5   : > { %p2876_p11 = scmp.ne.s32.totalorder %s2866_s23, 0  ;;  %p2877_p5 = scmp.ne.s32.totalorder %s2854_s8, 0 }
  0xd6   : > { %s2649_s28 = sand.u32 (!%p2877_p5), 1, %s2270_s25   ;;  %p2878_p3 = scmp.ne.s32.totalorder (!%p2877_p5), %s2861_s20, 0 }
  0xd7   : > { %1896 = dma.hbm_to_vmem [thread:$0]  (!%p2876_p11), %s2602_s29, 128, %s358_s3, %s2517_s18  }
  0xd8   : > { %366 = sbr.rel (%p2877_p5) target bundleno = 1786 (0x6fa), region = 48  ;;  %s2652_s14 = sshll.u32 (!%p2877_p5), %s2649_s28, 3 }
  0xd9   : > { %s369_s16 = scalar_lea.sflag (!%p2877_p5), [#allocation6], %s2649_s28  ;;  %s372_s11 = scalar_lea.vmem (!%p2877_p5), [#allocation5], %s2652_s14 }
  0xdf   : > { %2245 = dma.done.wait (%p2878_p3), %s369_s16, 128  }
  0xe0   : > { %2247 = vsyncadd (%p2878_p3), %s369_s16, 4294967168  ;;  %s377_s8 = sand.u32 1, %s2378_s30   ;;  %s381_s18 = scalar_lea.vmem [#allocation8], %s2652_s14 }
  0xe1   : > { %s378_s23 = scalar_lea.sflag [#allocation9], %s377_s8 }
  0xe2   : > { %2249 = dma.done.wait (%p2878_p3), %s378_s23, 256  }
  0xe3   : > { %2251 = vsyncadd (%p2878_p3), %s378_s23, 4294967040  ;;  %s390_s29 = scalar_lea.vmem [#allocation10], %s2652_s14  ;;  %p2879_p6 = scmp.eq.s32.totalorder %s2378_s30, 0 }
  0xe5   : > { %2253 = dma.done.wait (%p2879_p6), [#allocation12], 1024   ;;  %p2880_p0 = pmov %p2879_p6 }
  0xe7   : > { %2255 = vsyncadd (%p2880_p0), [#allocation12], 4294966272  ;;  %p2881_p4 = pmov %p2880_p0 }
  0xe8   : > { %p2882_p10 = pmov %p2880_p0 }
  0xe9   : > { %2257 = dma.done.wait (%p2881_p4), [#allocation15], 1024  }
  0xea   : > { %2259 = vsyncadd (%p2882_p10), [#allocation15], 4294966272  ;;  %vm451_vm0 = vcmask 261120   ;;  %v2297_v0 = vmov 0.0|0.0   ;;  %vm2298_vm1 = vmmov 0   ;;  %v2299_v1 = vmov 0.0  }
  0xeb   : > { %1826 = vmatprep.subr.bf16.mxu0 %v2297_v0  ;;  %1750 = vmatprep.mubr.msk.f32.mxu0 %vm2298_vm1, %v2299_v1  ;;  %452 = vst.msk [vmem:[#allocation2] sm:$0xff] %vm451_vm0, %v2299_v1  ;;  %v461_v2 = vld [vmem:[#allocation13] sm:$0xff]  ;;  %v462_v3 = vld [vmem:[#allocation13 + $0x8] sm:$0xff]  ;;  %v463_v4 = vld [vmem:[#allocation13 + $0x10] sm:$0xff]  ;;  %vm708_vm2 = vcmask 64512   ;;  %s2300_s30 = smov 120  }
  0xec   : > { %1832 = vmatprep.subr.bf16.mxu1 %v2297_v0  ;;  %1761 = vmatprep.mubr.msk.f32.mxu1 %vm2298_vm1, %v2299_v1  ;;  %v1827_v5 = vpack.c.bf16 %v462_v3, %v461_v2  ;;  %v464_v6 = vld [vmem:[#allocation13 + $0x18] sm:$0xff]  ;;  %v543_v8 = vld [vmem:[#allocation14] sm:$0xff]  ;;  %v544_v9 = vld [vmem:[#allocation14 + $0x8] sm:$0xff]  ;;  %s2301_s20 = smov 112   ;;  %s2302_s17 = smov 104   ;;  %vm1378_vm3 = vcmask 130048  }
  0xed   : > { %v1830_v7 = vpack.c.bf16 %v464_v6, %v463_v4  ;;  %v625_v10 = vld [vmem:[#allocation11] sm:$0xff]  ;;  %v626_v11 = vld [vmem:[#allocation11 + $0x8] sm:$0xff]  ;;  %v1833_v12 = vpack.c.bf16 %v544_v9, %v543_v8  ;;  %v627_v15 = vld [vmem:[#allocation11 + $0x10] sm:$0xff]  ;;  %s2303_s15 = smov 8   ;;  %s2304_s3 = smov 16   ;;  %vm1380_vm4 = vcmask 195584  }
  0xee   : > { %1828 = vmatpush3.bf16.msra.mxu0 %v1827_v5  ;;  %v457_v13 = vld [vmem:[%s381_s18] sm:$0xff]  ;;  %v1839_v14 = vpack.c.bf16 %v626_v11, %v625_v10  ;;  %v628_v16 = vld [vmem:[#allocation11 + $0x18] sm:$0xff]  ;;  %v545_v19 = vld [vmem:[#allocation14 + $0x10] sm:$0xff]  ;;  %s2305_s10 = smov 24   ;;  %s1703_s12 = sshll.u32 %s2278_s27, 7 }
  0xef   : > { %1829 = vmatprep.subr.bf16.mxu0 %v2297_v0  ;;  %1834 = vmatpush3.bf16.msra.mxu1 %v1833_v12  ;;  %v1842_v17 = vpack.c.bf16 %v628_v16, %v627_v15  ;;  %v622_v18 = vld [vmem:[%s372_s11] sm:$0xff]  ;;  %s446_s7 = scalar_lea.vmem [#allocation17], %s2652_s14  ;;  %s2883_s13 = sld [smem:[#allocation32_spill]] }
  0xf0   : > { %1835 = vmatprep.subr.bf16.mxu1 %v2297_v0  ;;  %v546_v20 = vld [vmem:[#allocation14 + $0x18] sm:$0xff]  ;;  %s1483_s22 = sshll.u32 %s446_s7, 4  ;;  %s1469_s9 = scalar_lea.sflag [#allocation7], %s2649_s28  ;;  %s2767_s22 = int_to_ptr.vmem [resolvable:$true] %s1483_s22 }
  0xf1   : > { %v1836_v21 = vpack.c.bf16 %v546_v20, %v545_v19  ;;  %v458_v22 = vld [vmem:[%s390_s29] sm:$0xff]  ;;  %s2192_s1 = scalar_lea.vmem %s2767_s22, 128  ;;  %p2884_p2 = scmp.ne.s32.totalorder %s2862_s21, 0 }
  0xf2   : > { %1831 = vmatpush3.bf16.msra.mxu0 %v1830_v7  ;;  %p2193_p13 = scmp.ne.s32.totalorder %s2767_s22, %s2192_s1  ;;  %s2306_s27 = smov [#allocation17]  }
  0xf3   : > { %1838 = vmatprep.subr.bf16.mxu0 %v2297_v0  ;;  %1837 = vmatpush3.bf16.msra.mxu1 %v1836_v21  ;;  %s2196_s14 = sshll.u32 %s2306_s27, 4  ;;  %s2197_s14 = int_to_ptr.vmem [resolvable:$false] %s2196_s14 }
  0xf4   : > { %1775 = vmatprep.subr.mxu1 %v2299_v1  ;;  %p2194_p1 = pnand %p2193_p13, %p2884_p2  ;;  %s2198_s16 = scalar_lea.vmem %s2197_s14, 256 }
  0xf5   : > { %1751 = vmatmul.mubr.msk.f32.vlgmr.msra.gmra.mrb[0].mxu0 %vm451_vm0, %v457_v13  ;;  %v1384_v13 = vld [vmem:[#allocation16] sm:$0xff]  ;;  %s2765_s5 = scalar_lea.hbm %s2883_s13, %s1703_s12  ;;  %p2199_p8 = scmp.lt.s32.totalorder %s2767_s22, %s2197_s14 }
  0xf6   : > { %1840 = vmatpush3.bf16.msra.mxu0 %v1839_v14  ;;  %1772 = vmatprep.mubr.msk.f32.mxu0 %vm2298_vm1, %v2299_v1  ;;  %v1385_v14 = vld [vmem:[#allocation16 + $0x8] sm:$0xff]  ;;  %p2195_p12 = pneg %p2194_p1  ;;  %p2200_p9 = scmp.lt.s32.totalorder %s2198_s16, %s2192_s1 }
  0xf7   : > { %1841 = vmatprep.subr.bf16.mxu0 %v2297_v0  ;;  %1762 = vmatmul.mubr.msk.f32.vlgmr.msra.gmra.mrb[0].mxu1 %vm451_vm0, %v458_v22  ;;  %v1845_v16 = vpack.c.bf16 %v1385_v14, %v1384_v13 }
  0xf8   : > { %1777 = vmatprep.mubr.msk.f32.mxu1 %vm2298_vm1, %v2299_v1  ;;  %p2201_p7 = por %p2200_p9, %p2199_p8 }
  0xfa   : > { %1843 = vmatpush3.bf16.msra.mxu0 %v1842_v17  ;;  %v1386_v17 = vld [vmem:[#allocation16 + $0x10] sm:$0xff]  ;;  %p2202_p11 = pnand %p2201_p7, %p2195_p12 }
  0xfb   : > { %1795 = vmatprep.subr.mxu0 %v2299_v1 }
  0xfd   : > { %1773 = vmatmul.mubr.msk.f32.vlgmr.msra.gmra.mrb[2].mxu0 %vm451_vm0, %v622_v18  ;;  %v1387_v18 = vld [vmem:[#allocation16 + $0x18] sm:$0xff] }
  0xfe   : > { %1797 = vmatprep.mubr.msk.f32.mxu0 %vm2298_vm1, %v2299_v1  ;;  %v1848_v20 = vpack.c.bf16 %v1387_v18, %v1386_v17 }
 0x1c8   : > { %v535_v23 = vpop.f32.mrb[0].mxu0 }
 0x1c9   : > { %541 = vst.msk [vmem:[#allocation3] sm:$0xff] %vm451_vm0, %v535_v23  ;;  %v1752_v24 = vpop.f32.mrb[1].mxu0 }
 0x1ca   : > { %v616_v28 = vpop.f32.mrb[0].mxu1 }
 0x1cb   : > { %621 = vst.msk [vmem:[#allocation4] sm:$0xff] %vm451_vm0, %v616_v28  ;;  %v1763_v29 = vpop.f32.mrb[1].mxu1 }
 0x1d0   : > { %v699_v25 = vpop.f32.mrb[2].mxu0  ;;  %v705_v26 = vld [vmem:[#allocation3] sm:$0xff] }
 0x1d1   : > { %1776 = vmatpush3.xpose.msk.msra.mxu1 %vm708_vm2, %v705_v26  ;;  %869 = vrot.lane.b32.xlu1 %v699_v25, %s2300_s30  ;;  %v1774_v27 = vpop.f32.mrb[3].mxu0 }
 0x1d2   : > { %1780 = vmatprep.subr.mxu1 %v2299_v1  ;;  %v707_v30 = vld [vmem:[#allocation4] sm:$0xff] }
 0x1d4   : > { %1778 = vmatmul.mubr.msk.f32.vlgmr.msra.gmra.mrb[2].mxu1 %vm708_vm2, %v699_v25 }
 0x1d5   : > { %1037 = vrot.lane.b32.xlu1 %v705_v26, %s2301_s20  ;;  %1782 = vmatprep.mubr.msk.f32.mxu1 %vm2298_vm1, %v2299_v1 }
 0x1d6   : > { %1781 = vmatpush3.msra.mxu1 %v707_v30 }
 0x1d7   : > { %1785 = vmatprep.subr.mxu1 %v2299_v1 }
 0x1d9   : > { %1035 = vrot.lane.b32.xlu1 %v699_v25, %s2301_s20 }
 0x1dd   : > { %1202 = vrot.lane.b32.xlu1 %v705_v26, %s2302_s17 }
 0x1e1   : > { %1200 = vrot.lane.b32.xlu1 %v699_v25, %s2302_s17 }
 0x1e5   : > { %1122 = vrot.lane.b32.xlu1 %v707_v30, %s2301_s20 }
 0x243   : > { %v870_v31 = vpop.permute.xlu1 %869 }
 0x247   : > { %v1038_v32 = vpop.permute.xlu1 %1037 }
 0x248   : > { %1796 = vmatpush3.xpose.msk.msra.mxu0 %vm708_vm2, %v1038_v32 }
 0x249   : > { %1805 = vmatprep.subr.mxu0 %v2299_v1 }
 0x24b   : > { %v1036_v33 = vpop.permute.xlu1 %1035 }
 0x24c   : > { %1798 = vmatmul.mubr.msk.f32.vlgmr.msra.gmra.mrb[4].mxu0 %vm708_vm2, %v1036_v33 }
 0x24d   : > { %1807 = vmatprep.mubr.msk.f32.mxu0 %vm2298_vm1, %v2299_v1 }
 0x24f   : > { %v1203_v34 = vpop.permute.xlu1 %1202 }
 0x250   : > { %1806 = vmatpush3.xpose.msk.msra.mxu0 %vm708_vm2, %v1203_v34 }
 0x251   : > { %1844 = vmatprep.subr.bf16.mxu0 %v2297_v0 }
 0x253   : > { %v1201_v35 = vpop.permute.xlu1 %1200 }
 0x254   : > { %1808 = vmatmul.mubr.msk.f32.vlgmr.msra.gmra.mrb[6].mxu0 %vm708_vm2, %v1201_v35 }
 0x255   : > { %1823 = vmatprep.mubr.msk.f32.mxu0 %vm2298_vm1, %v2299_v1  ;;  %1846 = vmatpush3.bf16.msra.mxu0 %v1845_v16 }
 0x256   : > { %1847 = vmatprep.subr.bf16.mxu0 %v2297_v0 }
 0x257   : > { %v1123_v61 = vpop.permute.xlu1 %1122 }
 0x259   : > { %1849 = vmatpush3.bf16.msra.mxu0 %v1848_v20 }
 0x2a7   : > { %v781_v36 = vpop.f32.mrb[2].mxu1 }
 0x2a8   : > { %v1779_v37 = vpop.f32.mrb[3].mxu1  ;;  %v785_v38 = vsel %vm708_vm2, %v781_v36, -inf }
 0x2a9   : > { %786 = vmax.xlane.f32.xlu0 %v785_v38 }
 0x2bf   : > { %871 = vrot.lane.b32.xlu0 %v705_v26, %s2300_s30 }
 0x31f   : > { %v1109_v39 = vpop.f32.mrb[4].mxu0 }
 0x320   : > { %v1799_v40 = vpop.f32.mrb[5].mxu0  ;;  %v1113_v41 = vsel %vm708_vm2, %v1109_v39, -inf }
 0x321   : > { %1114 = vmax.xlane.f32.xlu0 %v1113_v41  ;;  %v1382_v40 = vld [vmem:[#allocation2] sm:$0xff] }
 0x327   : > { %v1274_v42 = vpop.f32.mrb[6].mxu0 }
 0x328   : > { %v1809_v43 = vpop.f32.mrb[7].mxu0  ;;  %v1278_v44 = vsel %vm708_vm2, %v1274_v42, -inf }
 0x329   : > { %1279 = vmax.xlane.f32.xlu1 %v1278_v44 }
 0x336   : > { %v787_v45 = vpop.xlane.xlu0 %786 }
 0x337   : > { %v788_v46 = vsub.f32 %v781_v36, %v787_v45  ;;  %957 = vrot.lane.b32.xlu0 %v707_v30, %s2300_s30 }
 0x339   : > { %v789_v47 = vmul.f32 1.442695, %v788_v46 }
 0x33a   : > { %v872_v49 = vpop.permute.xlu0 %871 }
 0x33b   : > { %1974 = vpow2.f32 %v789_v47 }
 0x345   : > { %v1975_v48 = vpop.eup %1974 }
 0x346   : > { %1783 = vmatmul.mubr.msk.f32.vlgmr.msra.gmra.mrb[4].mxu1 %vm708_vm2, %v1975_v48  ;;  %v791_v11 = vsel %vm708_vm2, %v1975_v48, 0.0 }
 0x347   : > { %1786 = vmatpush3.xpose.msk.msra.mxu1 %vm708_vm2, %v872_v49  ;;  %1787 = vmatprep.mubr.msk.f32.mxu1 %vm2298_vm1, %v2299_v1 }
 0x348   : > { %1790 = vmatprep.subr.mxu1 %v2299_v1 }
 0x34a   : > { %1788 = vmatmul.mubr.msk.f32.vlgmr.msra.gmra.mrb[6].mxu1 %vm708_vm2, %v870_v31 }
 0x34b   : > { %1792 = vmatprep.mubr.msk.f32.mxu1 %vm2298_vm1, %v2299_v1 }
 0x3ae   : > { %v1115_v50 = vpop.xlane.xlu0 %1114 }
 0x3af   : > { %v1116_v51 = vsub.f32 %v1109_v39, %v1115_v50 }
 0x3b1   : > { %v1117_v58 = vmul.f32 1.442695, %v1116_v51 }
 0x3b2   : > { %v958_v52 = vpop.permute.xlu0 %957 }
 0x3b3   : > { %1791 = vmatpush3.msra.mxu1 %v958_v52  ;;  %1976 = vpow2.f32 %v1117_v58 }
 0x3b4   : > { %1800 = vmatprep.subr.mxu1 %v2299_v1 }
 0x3b6   : > { %v1280_v62 = vpop.xlane.xlu1 %1279 }
 0x3b7   : > { %v1281_v63 = vsub.f32 %v1274_v42, %v1280_v62 }
 0x3b9   : > { %v1282_v4 = vmul.f32 1.442695, %v1281_v63 }
 0x3bd   : > { %v1977_v59 = vpop.eup %1976 }
 0x3be   : > { %v1119_v60 = vsel %vm708_vm2, %v1977_v59, 0.0 }
 0x419   : > { %v2739_v53 = vpop.f32.mrb[4].mxu1 }
 0x41a   : > { %v1784_v54 = vpop.f32.mrb[5].mxu1 }
 0x41d   : > { %v943_v55 = vpop.f32.mrb[6].mxu1 }
 0x41e   : > { %v1789_v56 = vpop.f32.mrb[7].mxu1  ;;  %v947_v57 = vsel %vm708_vm2, %v943_v55, -inf }
 0x41f   : > { %948 = vmax.xlane.f32.xlu1 %v947_v57 }
 0x430   : > { %1287 = vrot.lane.b32.xlu1 %v707_v30, %s2302_s17 }
 0x454   : > { %1120 = vadd.xlane.f32.xlu1 %v1119_v60 }
 0x4ac   : > { %v949_v2 = vpop.xlane.xlu1 %948 }
 0x4ad   : > { %v950_v3 = vsub.f32 %v943_v55, %v949_v2 }
 0x4af   : > { %v951_v5 = vmul.f32 1.442695, %v950_v3 }
 0x4b0   : > { %v1288_v9 = vpop.permute.xlu1 %1287 }
 0x4b1   : > { %1978 = vpow2.f32 %v951_v5 }
 0x4b2   : > { %1980 = vpow2.f32 %v1282_v4 }
 0x4bb   : > { %v1979_v6 = vpop.eup %1978 }
 0x4bc   : > { %1793 = vmatmul.mubr.msk.f32.vlgmr.msra.gmra.mrb[8].mxu1 %vm708_vm2, %v1979_v6  ;;  %v953_v7 = vsel %vm708_vm2, %v1979_v6, 0.0  ;;  %v1981_v8 = vpop.eup %1980 }
 0x4bd   : > { %1801 = vmatpush3.msra.mxu1 %v1123_v61  ;;  %954 = vadd.xlane.f32.xlu0 %v953_v7  ;;  %v1284_v10 = vsel %vm708_vm2, %v1981_v8, 0.0 }
 0x4be   : > { %1802 = vmatprep.mubr.msk.f32.mxu1 %vm2298_vm1, %v2299_v1  ;;  %1810 = vmatprep.subr.mxu1 %v2299_v1 }
 0x4c0   : > { %1803 = vmatmul.mubr.msk.f32.vlgmr.msra.gmra.mrb[10].mxu1 %vm708_vm2, %v1977_v59 }
 0x4c1   : > { %1811 = vmatpush3.msra.mxu1 %v1288_v9  ;;  %1285 = vadd.xlane.f32.xlu0 %v1284_v10 }
 0x4c2   : > { %1812 = vmatprep.mubr.msk.f32.mxu1 %vm2298_vm1, %v2299_v1 }
 0x4c4   : > { %1813 = vmatmul.mubr.msk.f32.vlgmr.msra.gmra.mrb[12].mxu1 %vm708_vm2, %v1981_v8 }
 0x4c5   : > { %792 = vadd.xlane.f32.xlu0 %v791_v11 }
 0x4e1   : > { %v1121_v15 = vpop.xlane.xlu1 %1120 }
 0x54a   : > { %v955_v12 = vpop.xlane.xlu0 %954 }
 0x54b   : > { %1982 = vrcp.f32 %v955_v12 }
 0x54c   : > { %1984 = vrcp.f32 %v1121_v15 }
 0x54e   : > { %v1286_v19 = vpop.xlane.xlu0 %1285 }
 0x54f   : > { %1986 = vrcp.f32 %v1286_v19 }
 0x552   : > { %v793_v31 = vpop.xlane.xlu0 %792 }
 0x553   : > { %1988 = vrcp.f32 %v793_v31 }
 0x555   : > { %v1983_v1 = vpop.eup %1982 }
 0x556   : > { %v1985_v24 = vpop.eup %1984 }
 0x559   : > { %v1987_v28 = vpop.eup %1986 }
 0x55d   : > { %v1989_v32 = vpop.eup %1988 }
 0x55e   : > { %v868_v34 = vmul.f32 %v1989_v32, %v2739_v53 }
 0x58f   : > { %v1029_v21 = vpop.f32.mrb[8].mxu1 }
 0x590   : > { %v1034_v22 = vmul.f32 %v1983_v1, %v1029_v21  ;;  %v1794_v23 = vpop.f32.mrb[9].mxu1 }
 0x592   : > { %1366 = vrot.lane.b32.xlu1 %v1034_v22, %s2303_s15 }
 0x593   : > { %v1194_v25 = vpop.f32.mrb[10].mxu1 }
 0x594   : > { %v1199_v26 = vmul.f32 %v1985_v24, %v1194_v25  ;;  %v1804_v27 = vpop.f32.mrb[11].mxu1 }
 0x596   : > { %1370 = vrot.lane.b32.xlu0 %v1199_v26, %s2304_s3 }
 0x597   : > { %v1359_v0 = vpop.f32.mrb[12].mxu1 }
 0x598   : > { %v1364_v29 = vmul.f32 %v1987_v28, %v1359_v0  ;;  %v1814_v30 = vpop.f32.mrb[13].mxu1 }
 0x59a   : > { %1374 = vrot.lane.b32.xlu1 %v1364_v29, %s2305_s10 }
 0x604   : > { %v1367_v33 = vpop.permute.xlu1 %1366 }
 0x605   : > { %v1377_v36 = vsel %vm708_vm2, %v868_v34, %v1367_v33 }
 0x608   : > { %v1371_v35 = vpop.permute.xlu0 %1370 }
 0x609   : > { %v1379_v37 = vsel %vm1378_vm3, %v1377_v36, %v1371_v35 }
 0x60c   : > { %v1375_v38 = vpop.permute.xlu1 %1374 }
 0x60d   : > { %v1381_v39 = vsel %vm1380_vm4, %v1379_v37, %v1375_v38 }
 0x60e   : > { %1824 = vmatmul.mubr.msk.f32.vlgmr.msra.gmra.mrb[8].mxu0 %vm451_vm0, %v1381_v39 }
 0x6e1   : > { %v1457_v41 = vpop.f32.mrb[8].mxu0 }
 0x6e2   : > { %v1461_v42 = vadd.f32 %v1457_v41, %v1382_v40  ;;  %v1825_v43 = vpop.f32.mrb[9].mxu0 }
 0x6e4   : > { %1462 = vst.msk [vmem:[#allocation2] sm:$0xff] %vm451_vm0, %v1461_v42 }
 0x6eb   : > { %v1466_v44 = vld [vmem:[#allocation2] sm:$0xff] }
 0x6ec   : > { %1467 = vst.msk [vmem:[%s446_s7] sm:$0xff] %vm451_vm0, %v1466_v44 }
 0x6ed   : > { %2205 = shalt.err (!%p2202_p11)
}
 0x6ee   : > { %s2206_s28 = scalar_lea.hbm %s2765_s5, 128  ;;  %s2210_s23 = scalar_lea.hbm %s2883_s13, 256 }
 0x6ef   : > { %p2207_p5 = scmp.ne.s32.totalorder %s2765_s5, %s2206_s28  ;;  %p2211_p0 = scmp.lt.u32.totalorder %s2765_s5, %s2883_s13 }
 0x6f0   : > { %p2212_p4 = scmp.lt.u32.totalorder %s2210_s23, %s2206_s28  ;;  %p2214_p13 = scmp.lt.u32.totalorder %s2206_s28, %s2765_s5 }
 0x6f1   : > { %p2208_p3 = pnand %p2207_p5, %p2884_p2 }
 0x6f2   : > { %p2213_p10 = por %p2212_p4, %p2211_p0 }
 0x6f3   : > { %p2209_p6 = pneg %p2208_p3 }
 0x6f4   : > { %p2215_p1 = por %p2214_p13, %p2213_p10 }
 0x6f6   : > { %p2216_p12 = pnand %p2215_p1, %p2209_p6 }
 0x6f8   : > { %2219 = shalt.err (!%p2216_p12)
}
 0x6f9   : > { %1872 = dma.vmem_to_hbm [thread:$0]  (%p2884_p2), %s2767_s22, 128, %s2765_s5, %s1469_s9  }
 0x6fa PF: > { %s2885_s30 = sld [smem:[#allocation23_spill]]  ;;  %s2886_s20 = sld [smem:[#allocation28_spill]] }
 0x6fb   : > { %s2887_s17 = sld [smem:[#allocation25_spill]] }
 0x700   : > { %s1495_s15 = sand.u32 1, %s2885_s30   ;;  %p2888_p8 = scmp.ne.s32.totalorder %s2886_s20, 0 }
 0x701   : > { %p2889_p9 = scmp.ge.s32.totalorder %s2887_s17, 2  ;;  %s1496_s3 = scalar_lea.sflag [#allocation7], %s1495_s15 }
 0x703   : > { %p1898_p7 = pnand %p2889_p9, %p2888_p8 }
 0x705   : > { %2261 = dma.done.wait (!%p1898_p7), %s1496_s3, 128  }
 0x706   : > { %2263 = vsyncadd (!%p1898_p7), %s1496_s3, 4294967168  ;;  %s28_s29 = sadd.s32 1, %s2887_s17   ;;  %s2890_s21 = sld [smem:[#allocation27_spill]] }
 0x707   : > { %p25_p11 = scmp.ge.s32.totalorder %s28_s29, 4   ;;  %s2891_s27 = sld [smem:[#allocation24_spill]] }
 0x708   : > { %s2892_s28 = sld [smem:[#allocation26_spill]]  ;;  %s2893_s24 = smov %s2270_s25 }
 0x709   : > { %s2894_s25 = smov %s2274_s26  ;;  %27 = sbr.rel (!%p25_p11) target bundleno = 15 (0xf), region = 153 }
 0x70c   : > { %s2895_s26 = smov %s2890_s21 }
 0x710   :  { %1501 = vsyncpa [#allocation6], 1 }
 0x711   :  { %1503 = vsyncpa [#allocation6 + $0x1], 1 }
 0x712   :  { %1504 = vsyncpa [#allocation9], 1 }
 0x713   :  { %1506 = vsyncpa [#allocation9 + $0x1], 1 }
 0x714   :  { %1507 = vsyncpa [#allocation12], 1 }
 0x715   :  { %1508 = vsyncpa [#allocation15], 1 }
 0x716   :  { %1509 = vsyncpa [#allocation7], 1 }
 0x717   :  { %1511 = vsyncpa [#allocation7 + $0x1], 1 }

// kernel: tpu_custom_call.1
= control target key start
LH: loop header
LB: loop body
LE: loop exit
PB: predicated region body
PF: predicated region fallthrough
CT: control target
= control target key end

     0   :  { %s2815_s0 = inlined_call_operand.hbm [shape: f32[2,8,32], index: 0, kind: input, shape index: {}]   ;;  %s2816_s1 = inlined_call_operand.hbm [shape: f32[2,8,32], index: 1, kind: input, shape index: {}]   ;;  %s2817_s2 = inlined_call_operand.hbm [shape: f32[2,8,32], index: 2, kind: input, shape index: {}]   ;;  %s2818_s3 = inlined_call_operand.hbm [shape: f32[1,32,32], index: 3, kind: input, shape index: {}]   ;;  %s2819_s4 = inlined_call_operand.hbm [shape: f32[1,32,32], index: 4, kind: input, shape index: {}]   ;;  %s2820_s5 = inlined_call_operand.hbm [shape: f32[1,32,32], index: 5, kind: input, shape index: {}]   ;;  %s2821_s6 = inlined_call_operand.hbm [shape: f32[1,32,32], index: 6, kind: input, shape index: {}]   ;;  %s2822_s7 = inlined_call_operand.hbm [shape: f32[2,8,32], index: 7, kind: output, shape index: {}]  }
   0x1   :  { %2847 = sst [smem:[#allocation29_spill]] %s2816_s1 }
   0x2   :  { %2848 = sst [smem:[#allocation30_spill]] %s2818_s3 }
   0x3   :  { %2849 = sst [smem:[#allocation31_spill]] %s2820_s5 }
   0x4   :  { %2850 = sst [smem:[#allocation32_spill]] %s2822_s7 }
   0x5   :  { %12 = vsyncpa [#allocation6], 0 }
   0x6   :  { %14 = vsyncpa [#allocation6 + $0x1], 0 }
   0x7   :  { %15 = vsyncpa [#allocation9], 0 }
   0x8   :  { %17 = vsyncpa [#allocation9 + $0x1], 0 }
   0x9   :  { %18 = vsyncpa [#allocation12], 0 }
   0xa   :  { %19 = vsyncpa [#allocation15], 0 }
   0xb   :  { %20 = vsyncpa [#allocation7], 0 }
   0xc   :  { %22 = vsyncpa [#allocation7 + $0x1], 0  ;;  %s2347_s24 = smov 0   ;;  %s2349_s25 = smov 0  }
   0xd   :  { %s2351_s26 = smov 0   ;;  %s2353_s27 = smov 0  }
   0xe   :  { %s2355_s28 = smov 0   ;;  %s2357_s29 = smov 0  }
   0xf LB: > { %2851 = sst [smem:[#allocation23_spill]] %s2266_s24  ;;  %s2378_s30 = sadd.s32 4294967295, %s2286_s29   ;;  %s2286_s29 = sphi %s2357_s29, %s28_s29   ;;  %s2282_s28 = sphi %s2355_s28, %s2892_s28   ;;  %s2278_s27 = sphi %s2353_s27, %s2891_s27   ;;  %s2274_s26 = sphi %s2351_s26, %s2895_s26   ;;  %s2270_s25 = sphi %s2349_s25, %s2894_s25   ;;  %s2266_s24 = sphi %s2347_s24, %s2893_s24  }
  0x10   : > { %2852 = sst [smem:[#allocation24_spill]] %s2282_s28  ;;  %p1665_p0 = scmp.ge.s32.totalorder %s2286_s29, 1 }
  0x11   : > { %2853 = sst [smem:[#allocation25_spill]] %s2286_s29  ;;  %p2832_p1 = scmp.eq.s32.totalorder %s2378_s30, 0 }
  0x12   : > { %p244_p2 = scmp.lt.s32.totalorder %s2286_s29, 3  ;;  %s2288_s9 = smov [#allocation11]  }
  0x13   : > { %s256_s10 = sshll.u32 %s2288_s9, 4  ;;  %s2289_s12 = smov [#allocation14]   ;;  %s2387_s10 = int_to_ptr.vmem [resolvable:$true] %s256_s10 }
  0x14   : > { %p2383_p3 = pnand %p1665_p0, %p244_p2  ;;  %s282_s13 = sshll.u32 %s2289_s12, 4  ;;  %s2398_s13 = int_to_ptr.vmem [resolvable:$true] %s282_s13 }
  0x15   : > { %s2856_s3 = sld [smem:[#allocation30_spill]] }
  0x16   : > { %s2854_s8 = scalar_select %p2383_p3, 1, 0 }
  0x17   : > { %p1874_p4 = pneg %p2383_p3 }
  0x19   : > { %p2394_p6 = pnand %p1874_p4, %p2832_p1 }
  0x1b   : > { %s2855_s11 = scalar_select %p2394_p6, 1, 0 }
  0x1c   : > { %s1990_s16 = scalar_lea.hbm %s2856_s3, 512  ;;  %p2408_p8 = pneg %p2394_p6 }
  0x1d   : > { %p1991_p7 = scmp.ne.s32.totalorder %s2856_s3, %s1990_s16  ;;  %p1997_p11 = scmp.lt.u32.totalorder %s1990_s16, %s2856_s3 }
  0x1e   : > { %s2857_s19 = scalar_select %p2408_p8, 1, 0 }
  0x1f   : > { %p1993_p9 = pnand %p2408_p8, %p1991_p7 }
  0x21   : > { %p1994_p10 = pneg %p1993_p9 }
  0x23   : > { %p1999_p12 = pnand %p1997_p11, %p1994_p10 }
  0x25   : > { %2002 = shalt.err (!%p1999_p12)
}
  0x26   : > { %s2003_s22 = scalar_lea.vmem %s2387_s10, 512  ;;  %p2011_p4 = scmp.lt.s32.totalorder %s2387_s10, %s2387_s10 }
  0x27   : > { %p2004_p13 = scmp.ne.s32.totalorder %s2387_s10, %s2003_s22  ;;  %p2012_p5 = scmp.lt.s32.totalorder %s2003_s22, %s2003_s22 }
  0x29   : > { %p2006_p0 = pnand %p2004_p13, %p2408_p8  ;;  %p2013_p7 = por %p2012_p5, %p2011_p4 }
  0x2b   : > { %p2007_p2 = pneg %p2006_p0 }
  0x2d   : > { %p2014_p9 = pnand %p2013_p7, %p2007_p2 }
  0x2f   : > { %2017 = shalt.err (!%p2014_p9)
}
  0x30   : > { %s2823_s23 = smov 128   ;;  %s2825_s9 = smov 8  }
  0x31   : > { %1877 = dma.hbm_to_vmem [thread:$0]  (!%p2394_p6), %s2856_s3, 512, %s2387_s10, [#allocation12], %s2823_s23, %s2823_s23, %s2825_s9  }
  0x32   : > { %s2858_s5 = sld [smem:[#allocation31_spill]] }
  0x38   : > { %s2018_s17 = scalar_lea.hbm %s2858_s5, 512 }
  0x39   : > { %p2019_p5 = scmp.ne.s32.totalorder %s2858_s5, %s2018_s17  ;;  %p2025_p12 = scmp.lt.u32.totalorder %s2018_s17, %s2858_s5 }
  0x3b   : > { %p2021_p10 = pnand %p2019_p5, %p2408_p8 }
  0x3d   : > { %p2022_p11 = pneg %p2021_p10 }
  0x3f   : > { %p2027_p13 = pnand %p2025_p12, %p2022_p11 }
  0x41   : > { %2030 = shalt.err (!%p2027_p13)
}
  0x42   : > { %s2031_s10 = scalar_lea.vmem %s2398_s13, 512  ;;  %p2039_p7 = scmp.lt.s32.totalorder %s2398_s13, %s2398_s13 }
  0x43   : > { %p2032_p0 = scmp.ne.s32.totalorder %s2398_s13, %s2031_s10  ;;  %p2040_p9 = scmp.lt.s32.totalorder %s2031_s10, %s2031_s10 }
  0x45   : > { %p2034_p2 = pnand %p2032_p0, %p2408_p8  ;;  %p2041_p5 = por %p2040_p9, %p2039_p7 }
  0x47   : > { %p2035_p4 = pneg %p2034_p2 }
  0x49   : > { %p2042_p10 = pnand %p2041_p5, %p2035_p4 }
  0x4b   : > { %2045 = shalt.err (!%p2042_p10)
}
  0x4c   : > { %1883 = dma.hbm_to_vmem [thread:$0]  (!%p2394_p6), %s2858_s5, 512, %s2398_s13, [#allocation15], %s2823_s23, %s2823_s23, %s2825_s9  }
  0x4d   : > { %s1664_s15 = sadd.s32 4294967294, %s2286_s29   ;;  %s47_s16 = sadd.s32 1, %s2282_s28 }
  0x4e   : > { %p49_p11 = scmp.ge.s32.totalorder %s47_s16, 2  ;;  %s56_s17 = sadd.s32 1, %s2274_s26 }
  0x4f   : > { %p63_p12 = scmp.ne.s32.totalorder %s2274_s26, %s2270_s25  ;;  %p64_p13 = scmp.eq.s32.totalorder %s2286_s29, 0 }
  0x50   : > { %s2897_s16 = smov (%p49_p11, %s47_s16), 0  ;;  %p69_p2 = scmp.ne.s32.totalorder %s2270_s25, %s2266_s24 }
  0x51   : > { %2859 = sst [smem:[#allocation26_spill]] %s2897_s16  ;;  %p2466_p0 = por %p64_p13, %p63_p12 }
  0x52   : > { %s51_s13 = ssub.s32 %s2282_s28, %s2897_s16  ;;  %p231_p4 = scmp.eq.s32.totalorder %s2378_s30, 1 }
  0x53   : > { %p54_p7 = scmp.eq.s32.totalorder %s51_s13, 0  ;;  %p2477_p9 = por %p2832_p1, %p69_p2 }
  0x54   : > { %p2481_p5 = por %p231_p4, %p63_p12  ;;  %p237_p10 = scmp.eq.s32.totalorder %s1664_s15, 1 }
  0x55   : > { %s2861_s20 = scalar_select %p2477_p9, 1, 0 }
  0x56   : > { %s2862_s21 = scalar_select %p2481_p5, 1, 0 }
  0x57   : > { %s2486_s22 = scalar_select %p54_p7, %s2274_s26, %s56_s17  }
  0x58   : > { %p2488_p11 = por %p237_p10, %p69_p2  ;;  %p1905_p13 = scmp.lt.s32.totalorder %s2286_s29, 2 }
  0x59   : > { %2863 = sst [smem:[#allocation27_spill]] %s2486_s22  ;;  %s2827_s12 = sand.u32 1, %s2274_s26  }
  0x5a   : > { %s2864_s10 = scalar_select %p2488_p11, 1, 0 }
  0x5b   : > { %s2495_s14 = sshll.u32 %s2282_s28, 7  ;;  %s2499_s13 = sshll.u32 %s2827_s12, 3 }
  0x5c   : > { %2865 = sst [smem:[#allocation28_spill]] %s2864_s10  ;;  %p2503_p12 = pnand %p1905_p13, %p2466_p0 }
  0x5d   : > { %s328_s15 = sand.u32 1, %s2286_s29   ;;  %s2867_s1 = sld [smem:[#allocation29_spill]] }
  0x5e   : > { %s2866_s23 = scalar_select %p2503_p12, 1, 0 }
  0x5f   : > { %s332_s5 = scalar_lea.vmem [#allocation8], %s2499_s13  ;;  %s2517_s18 = scalar_lea.sflag [#allocation9], %s328_s15 }
  0x60   : > { %s339_s12 = sshll.u32 %s332_s5, 4  ;;  %p2523_p2 = pneg %p2503_p12  ;;  %s2515_s12 = int_to_ptr.vmem [resolvable:$true] %s339_s12 }
  0x62   : > { %s2868_s28 = scalar_select %p2523_p2, 1, 0 }
  0x63   : > { %s2512_s3 = scalar_lea.hbm %s2867_s1, %s2495_s14  ;;  %s2051_s22 = scalar_lea.hbm %s2867_s1, 256 }
  0x64   : > { %s2046_s16 = scalar_lea.hbm %s2512_s3, 128  ;;  %p2052_p10 = scmp.lt.u32.totalorder %s2512_s3, %s2867_s1 }
  0x65   : > { %p2047_p0 = scmp.ne.s32.totalorder %s2512_s3, %s2046_s16  ;;  %p2053_p13 = scmp.lt.u32.totalorder %s2051_s22, %s2046_s16 }
  0x66   : > { %p2055_p11 = scmp.lt.u32.totalorder %s2046_s16, %s2512_s3 }
  0x67   : > { %p2049_p4 = pnand %p2523_p2, %p2047_p0  ;;  %p2054_p1 = por %p2053_p13, %p2052_p10 }
  0x69   : > { %p2050_p7 = pneg %p2049_p4  ;;  %p2056_p5 = por %p2055_p11, %p2054_p1 }
  0x6b   : > { %p2057_p9 = pnand %p2056_p5, %p2050_p7 }
  0x6d   : > { %2060 = shalt.err (!%p2057_p9)
}
  0x6e   : > { %s2061_s15 = scalar_lea.vmem %s2515_s12, 128  ;;  %s2292_s9 = smov [#allocation8]  }
  0x6f   : > { %p2062_p0 = scmp.ne.s32.totalorder %s2515_s12, %s2061_s15  ;;  %s2066_s17 = sshll.u32 %s2292_s9, 4  ;;  %s2067_s17 = int_to_ptr.vmem [resolvable:$false] %s2066_s17 }
  0x70   : > { %s2068_s29 = scalar_lea.vmem %s2067_s17, 256  ;;  %p2069_p6 = scmp.lt.s32.totalorder %s2515_s12, %s2067_s17 }
  0x71   : > { %p2064_p4 = pnand %p2062_p0, %p2523_p2  ;;  %p2070_p8 = scmp.lt.s32.totalorder %s2068_s29, %s2061_s15 }
  0x73   : > { %p2065_p3 = pneg %p2064_p4  ;;  %p2071_p10 = por %p2070_p8, %p2069_p6 }
  0x75   : > { %p2072_p13 = pnand %p2071_p10, %p2065_p3 }
  0x77   : > { %2075 = shalt.err (!%p2072_p13)
}
  0x78   : > { %1893 = dma.hbm_to_vmem [thread:$0]  (!%p2503_p12), %s2512_s3, 128, %s2515_s12, %s2517_s18  }
  0x79   : > { %s2293_s16 = smov [#allocation13]   ;;  %s2294_s5 = smov [#allocation16]  }
  0x7a   : > { %s269_s22 = sshll.u32 %s2293_s16, 4  ;;  %s295_s1 = sshll.u32 %s2294_s5, 4  ;;  %s270_s22 = int_to_ptr.vmem [resolvable:$true] %s269_s22  ;;  %s296_s1 = int_to_ptr.vmem [resolvable:$true] %s295_s1 }
  0x7b   : > { %s2076_s17 = scalar_lea.hbm %s2819_s4, 512  ;;  %p2869_p3 = scmp.ne.s32.totalorder %s2857_s19, 0 }
  0x7c   : > { %p2077_p1 = scmp.ne.s32.totalorder %s2819_s4, %s2076_s17  ;;  %p2083_p9 = scmp.lt.u32.totalorder %s2076_s17, %s2819_s4 }
  0x7e   : > { %p2079_p6 = pnand %p2077_p1, %p2869_p3 }
  0x80   : > { %p2080_p8 = pneg %p2079_p6 }
  0x82   : > { %p2085_p5 = pnand %p2083_p9, %p2080_p8 }
  0x84   : > { %2088 = shalt.err (!%p2085_p5)
}
  0x85   : > { %s2089_s3 = scalar_lea.vmem %s270_s22, 512  ;;  %p2097_p4 = scmp.lt.s32.totalorder %s270_s22, %s270_s22 }
  0x86   : > { %p2090_p11 = scmp.ne.s32.totalorder %s270_s22, %s2089_s3  ;;  %p2098_p10 = scmp.lt.s32.totalorder %s2089_s3, %s2089_s3 }
  0x88   : > { %p2092_p7 = pnand %p2090_p11, %p2869_p3  ;;  %p2099_p13 = por %p2098_p10, %p2097_p4 }
  0x8a   : > { %p2093_p0 = pneg %p2092_p7 }
  0x8c   : > { %p2100_p12 = pnand %p2099_p13, %p2093_p0 }
  0x8e   : > { %2103 = shalt.err (!%p2100_p12)
}
  0x8f   : > { %p2870_p1 = scmp.ne.s32.totalorder %s2855_s11, 0  ;;  %s2871_s10 = smov 8  }
  0x90   : > { %s2872_s12 = smov 128   ;;  %s2104_s9 = scalar_lea.hbm %s2821_s6, 512 }
  0x91   : > { %1880 = dma.hbm_to_vmem [thread:$0]  (!%p2870_p1), %s2819_s4, 512, %s270_s22, [#allocation12], %s2872_s12, %s2872_s12, %s2871_s10  }
  0x92   : > { %p2105_p6 = scmp.ne.s32.totalorder %s2821_s6, %s2104_s9  ;;  %p2111_p9 = scmp.lt.u32.totalorder %s2104_s9, %s2821_s6 }
  0x94   : > { %p2107_p12 = pnand %p2105_p6, %p2869_p3 }
  0x96   : > { %p2108_p8 = pneg %p2107_p12 }
  0x98   : > { %p2113_p5 = pnand %p2111_p9, %p2108_p8 }
  0x9a   : > { %2116 = shalt.err (!%p2113_p5)
}
  0x9b   : > { %s2117_s7 = scalar_lea.vmem %s296_s1, 512  ;;  %p2125_p4 = scmp.lt.s32.totalorder %s296_s1, %s296_s1 }
  0x9c   : > { %p2118_p11 = scmp.ne.s32.totalorder %s296_s1, %s2117_s7  ;;  %p2126_p10 = scmp.lt.s32.totalorder %s2117_s7, %s2117_s7 }
  0x9e   : > { %p2120_p7 = pnand %p2118_p11, %p2869_p3  ;;  %p2127_p13 = por %p2126_p10, %p2125_p4 }
  0xa0   : > { %p2121_p0 = pneg %p2120_p7 }
  0xa2   : > { %p2128_p2 = pnand %p2127_p13, %p2121_p0 }
  0xa4   : > { %2131 = shalt.err (!%p2128_p2)
}
  0xa5   : > { %1886 = dma.hbm_to_vmem [thread:$0]  (!%p2870_p1), %s2821_s6, 512, %s296_s1, [#allocation15], %s2872_s12, %s2872_s12, %s2871_s10  }
  0xa6   : > { %s2593_s5 = scalar_lea.hbm %s2815_s0, %s2495_s14  ;;  %s313_s11 = scalar_lea.vmem [#allocation5], %s2499_s13 }
  0xa7   : > { %s321_s9 = sshll.u32 %s313_s11, 4  ;;  %s2602_s29 = scalar_lea.hbm %s2817_s2, %s2495_s14  ;;  %s2596_s9 = int_to_ptr.vmem [resolvable:$true] %s321_s9 }
  0xa8   : > { %s2873_s3 = sand.u32 1, %s2274_s26   ;;  %s2132_s10 = scalar_lea.hbm %s2593_s5, 128 }
  0xa9   : > { %s310_s1 = scalar_lea.sflag [#allocation6], %s2873_s3  ;;  %p2133_p2 = scmp.ne.s32.totalorder %s2593_s5, %s2132_s10 }
  0xaa   : > { %p2874_p3 = scmp.ne.s32.totalorder %s2868_s28, 0  ;;  %s2137_s22 = scalar_lea.hbm %s2815_s0, 256 }
  0xab   : > { %p2138_p12 = scmp.lt.u32.totalorder %s2593_s5, %s2815_s0  ;;  %p2139_p8 = scmp.lt.u32.totalorder %s2137_s22, %s2132_s10 }
  0xac   : > { %p2135_p1 = pnand %p2133_p2, %p2874_p3  ;;  %p2141_p5 = scmp.lt.u32.totalorder %s2132_s10, %s2593_s5 }
  0xad   : > { %p2140_p9 = por %p2139_p8, %p2138_p12 }
  0xae   : > { %p2136_p6 = pneg %p2135_p1 }
  0xaf   : > { %p2142_p11 = por %p2141_p5, %p2140_p9 }
  0xb1   : > { %p2143_p7 = pnand %p2142_p11, %p2136_p6 }
  0xb3   : > { %2146 = shalt.err (!%p2143_p7)
}
  0xb4   : > { %s2147_s14 = scalar_lea.vmem %s2596_s9, 128  ;;  %s2295_s16 = smov [#allocation5]  }
  0xb5   : > { %p2148_p0 = scmp.ne.s32.totalorder %s2596_s9, %s2147_s14  ;;  %s2152_s11 = sshll.u32 %s2295_s16, 4  ;;  %s2153_s11 = int_to_ptr.vmem [resolvable:$false] %s2152_s11 }
  0xb6   : > { %s2154_s17 = scalar_lea.vmem %s2153_s11, 256  ;;  %p2155_p13 = scmp.lt.s32.totalorder %s2596_s9, %s2153_s11 }
  0xb7   : > { %p2150_p4 = pnand %p2148_p0, %p2874_p3  ;;  %p2156_p2 = scmp.lt.s32.totalorder %s2154_s17, %s2147_s14 }
  0xb9   : > { %p2151_p10 = pneg %p2150_p4  ;;  %p2157_p1 = por %p2156_p2, %p2155_p13 }
  0xbb   : > { %p2158_p12 = pnand %p2157_p1, %p2151_p10 }
  0xbd   : > { %2161 = shalt.err (!%p2158_p12)
}
  0xbe   : > { %p2875_p6 = scmp.ne.s32.totalorder %s2866_s23, 0  ;;  %s350_s15 = scalar_lea.vmem [#allocation10], %s2499_s13 }
  0xbf   : > { %s357_s3 = sshll.u32 %s350_s15, 4  ;;  %s2162_s10 = scalar_lea.hbm %s2602_s29, 128  ;;  %s358_s3 = int_to_ptr.vmem [resolvable:$true] %s357_s3 }
  0xc0   : > { %1890 = dma.hbm_to_vmem [thread:$0]  (!%p2875_p6), %s2593_s5, 128, %s2596_s9, %s310_s1  }
  0xc1   : > { %p2163_p8 = scmp.ne.s32.totalorder %s2602_s29, %s2162_s10  ;;  %s2167_s22 = scalar_lea.hbm %s2817_s2, 256 }
  0xc2   : > { %p2168_p11 = scmp.lt.u32.totalorder %s2602_s29, %s2817_s2  ;;  %p2169_p7 = scmp.lt.u32.totalorder %s2167_s22, %s2162_s10 }
  0xc3   : > { %p2165_p9 = pnand %p2163_p8, %p2874_p3  ;;  %p2171_p4 = scmp.lt.u32.totalorder %s2162_s10, %s2602_s29 }
  0xc4   : > { %p2170_p0 = por %p2169_p7, %p2168_p11 }
  0xc5   : > { %p2166_p5 = pneg %p2165_p9 }
  0xc6   : > { %p2172_p10 = por %p2171_p4, %p2170_p0 }
  0xc8   : > { %p2173_p13 = pnand %p2172_p10, %p2166_p5 }
  0xca   : > { %2176 = shalt.err (!%p2173_p13)
}
  0xcb   : > { %s2177_s13 = scalar_lea.vmem %s358_s3, 128  ;;  %s2296_s5 = smov [#allocation10]  }
  0xcc   : > { %p2178_p2 = scmp.ne.s32.totalorder %s358_s3, %s2177_s13  ;;  %s2182_s9 = sshll.u32 %s2296_s5, 4  ;;  %s2183_s9 = int_to_ptr.vmem [resolvable:$false] %s2182_s9 }
  0xcd   : > { %s2184_s1 = scalar_lea.vmem %s2183_s9, 256  ;;  %p2185_p8 = scmp.lt.s32.totalorder %s358_s3, %s2183_s9 }
  0xce   : > { %p2180_p1 = pnand %p2178_p2, %p2874_p3  ;;  %p2186_p9 = scmp.lt.s32.totalorder %s2184_s1, %s2177_s13 }
  0xd0   : > { %p2181_p12 = pneg %p2180_p1  ;;  %p2187_p6 = por %p2186_p9, %p2185_p8 }
  0xd2   : > { %p2188_p7 = pnand %p2187_p6, %p2181_p12 }
  0xd4   : > { %2191 = shalt.err (!%p2188_p7)
}
  0xd5   : > { %p2876_p11 = scmp.ne.s32.totalorder %s2866_s23, 0  ;;  %p2877_p5 = scmp.ne.s32.totalorder %s2854_s8, 0 }
  0xd6   : > { %s2649_s28 = sand.u32 (!%p2877_p5), 1, %s2270_s25   ;;  %p2878_p3 = scmp.ne.s32.totalorder (!%p2877_p5), %s2861_s20, 0 }
  0xd7   : > { %1896 = dma.hbm_to_vmem [thread:$0]  (!%p2876_p11), %s2602_s29, 128, %s358_s3, %s2517_s18  }
  0xd8   : > { %366 = sbr.rel (%p2877_p5) target bundleno = 1786 (0x6fa), region = 48  ;;  %s2652_s14 = sshll.u32 (!%p2877_p5), %s2649_s28, 3 }
  0xd9   : > { %s369_s16 = scalar_lea.sflag (!%p2877_p5), [#allocation6], %s2649_s28  ;;  %s372_s11 = scalar_lea.vmem (!%p2877_p5), [#allocation5], %s2652_s14 }
  0xdf   : > { %2245 = dma.done.wait (%p2878_p3), %s369_s16, 128  }
  0xe0   : > { %2247 = vsyncadd (%p2878_p3), %s369_s16, 4294967168  ;;  %s377_s8 = sand.u32 1, %s2378_s30   ;;  %s381_s18 = scalar_lea.vmem [#allocation8], %s2652_s14 }
  0xe1   : > { %s378_s23 = scalar_lea.sflag [#allocation9], %s377_s8 }
  0xe2   : > { %2249 = dma.done.wait (%p2878_p3), %s378_s23, 256  }
  0xe3   : > { %2251 = vsyncadd (%p2878_p3), %s378_s23, 4294967040  ;;  %s390_s29 = scalar_lea.vmem [#allocation10], %s2652_s14  ;;  %p2879_p6 = scmp.eq.s32.totalorder %s2378_s30, 0 }
  0xe5   : > { %2253 = dma.done.wait (%p2879_p6), [#allocation12], 1024   ;;  %p2880_p0 = pmov %p2879_p6 }
  0xe7   : > { %2255 = vsyncadd (%p2880_p0), [#allocation12], 4294966272  ;;  %p2881_p4 = pmov %p2880_p0 }
  0xe8   : > { %p2882_p10 = pmov %p2880_p0 }
  0xe9   : > { %2257 = dma.done.wait (%p2881_p4), [#allocation15], 1024  }
  0xea   : > { %2259 = vsyncadd (%p2882_p10), [#allocation15], 4294966272  ;;  %vm451_vm0 = vcmask 261120   ;;  %v2297_v0 = vmov 0.0|0.0   ;;  %vm2298_vm1 = vmmov 0   ;;  %v2299_v1 = vmov 0.0  }
  0xeb   : > { %1826 = vmatprep.subr.bf16.mxu0 %v2297_v0  ;;  %1750 = vmatprep.mubr.msk.f32.mxu0 %vm2298_vm1, %v2299_v1  ;;  %452 = vst.msk [vmem:[#allocation2] sm:$0xff] %vm451_vm0, %v2299_v1  ;;  %v461_v2 = vld [vmem:[#allocation13] sm:$0xff]  ;;  %v462_v3 = vld [vmem:[#allocation13 + $0x8] sm:$0xff]  ;;  %v463_v4 = vld [vmem:[#allocation13 + $0x10] sm:$0xff]  ;;  %vm708_vm2 = vcmask 64512   ;;  %s2300_s30 = smov 120  }
  0xec   : > { %1832 = vmatprep.subr.bf16.mxu1 %v2297_v0  ;;  %1761 = vmatprep.mubr.msk.f32.mxu1 %vm2298_vm1, %v2299_v1  ;;  %v1827_v5 = vpack.c.bf16 %v462_v3, %v461_v2  ;;  %v464_v6 = vld [vmem:[#allocation13 + $0x18] sm:$0xff]  ;;  %v543_v8 = vld [vmem:[#allocation14] sm:$0xff]  ;;  %v544_v9 = vld [vmem:[#allocation14 + $0x8] sm:$0xff]  ;;  %s2301_s20 = smov 112   ;;  %s2302_s17 = smov 104   ;;  %vm1378_vm3 = vcmask 130048  }
  0xed   : > { %v1830_v7 = vpack.c.bf16 %v464_v6, %v463_v4  ;;  %v625_v10 = vld [vmem:[#allocation11] sm:$0xff]  ;;  %v626_v11 = vld [vmem:[#allocation11 + $0x8] sm:$0xff]  ;;  %v1833_v12 = vpack.c.bf16 %v544_v9, %v543_v8  ;;  %v627_v15 = vld [vmem:[#allocation11 + $0x10] sm:$0xff]  ;;  %s2303_s15 = smov 8   ;;  %s2304_s3 = smov 16   ;;  %vm1380_vm4 = vcmask 195584  }
  0xee   : > { %1828 = vmatpush3.bf16.msra.mxu0 %v1827_v5  ;;  %v457_v13 = vld [vmem:[%s381_s18] sm:$0xff]  ;;  %v1839_v14 = vpack.c.bf16 %v626_v11, %v625_v10  ;;  %v628_v16 = vld [vmem:[#allocation11 + $0x18] sm:$0xff]  ;;  %v545_v19 = vld [vmem:[#allocation14 + $0x10] sm:$0xff]  ;;  %s2305_s10 = smov 24   ;;  %s1703_s12 = sshll.u32 %s2278_s27, 7 }
  0xef   : > { %1829 = vmatprep.subr.bf16.mxu0 %v2297_v0  ;;  %1834 = vmatpush3.bf16.msra.mxu1 %v1833_v12  ;;  %v1842_v17 = vpack.c.bf16 %v628_v16, %v627_v15  ;;  %v622_v18 = vld [vmem:[%s372_s11] sm:$0xff]  ;;  %s446_s7 = scalar_lea.vmem [#allocation17], %s2652_s14  ;;  %s2883_s13 = sld [smem:[#allocation32_spill]] }
  0xf0   : > { %1835 = vmatprep.subr.bf16.mxu1 %v2297_v0  ;;  %v546_v20 = vld [vmem:[#allocation14 + $0x18] sm:$0xff]  ;;  %s1483_s22 = sshll.u32 %s446_s7, 4  ;;  %s1469_s9 = scalar_lea.sflag [#allocation7], %s2649_s28  ;;  %s2767_s22 = int_to_ptr.vmem [resolvable:$true] %s1483_s22 }
  0xf1   : > { %v1836_v21 = vpack.c.bf16 %v546_v20, %v545_v19  ;;  %v458_v22 = vld [vmem:[%s390_s29] sm:$0xff]  ;;  %s2192_s1 = scalar_lea.vmem %s2767_s22, 128  ;;  %p2884_p2 = scmp.ne.s32.totalorder %s2862_s21, 0 }
  0xf2   : > { %1831 = vmatpush3.bf16.msra.mxu0 %v1830_v7  ;;  %p2193_p13 = scmp.ne.s32.totalorder %s2767_s22, %s2192_s1  ;;  %s2306_s27 = smov [#allocation17]  }
  0xf3   : > { %1838 = vmatprep.subr.bf16.mxu0 %v2297_v0  ;;  %1837 = vmatpush3.bf16.msra.mxu1 %v1836_v21  ;;  %s2196_s14 = sshll.u32 %s2306_s27, 4  ;;  %s2197_s14 = int_to_ptr.vmem [resolvable:$false] %s2196_s14 }
  0xf4   : > { %1775 = vmatprep.subr.mxu1 %v2299_v1  ;;  %p2194_p1 = pnand %p2193_p13, %p2884_p2  ;;  %s2198_s16 = scalar_lea.vmem %s2197_s14, 256 }
  0xf5   : > { %1751 = vmatmul.mubr.msk.f32.vlgmr.msra.gmra.mrb[0].mxu0 %vm451_vm0, %v457_v13  ;;  %v1384_v13 = vld [vmem:[#allocation16] sm:$0xff]  ;;  %s2765_s5 = scalar_lea.hbm %s2883_s13, %s1703_s12  ;;  %p2199_p8 = scmp.lt.s32.totalorder %s2767_s22, %s2197_s14 }
  0xf6   : > { %1840 = vmatpush3.bf16.msra.mxu0 %v1839_v14  ;;  %1772 = vmatprep.mubr.msk.f32.mxu0 %vm2298_vm1, %v2299_v1  ;;  %v1385_v14 = vld [vmem:[#allocation16 + $0x8] sm:$0xff]  ;;  %p2195_p12 = pneg %p2194_p1  ;;  %p2200_p9 = scmp.lt.s32.totalorder %s2198_s16, %s2192_s1 }
  0xf7   : > { %1841 = vmatprep.subr.bf16.mxu0 %v2297_v0  ;;  %1762 = vmatmul.mubr.msk.f32.vlgmr.msra.gmra.mrb[0].mxu1 %vm451_vm0, %v458_v22  ;;  %v1845_v16 = vpack.c.bf16 %v1385_v14, %v1384_v13 }
  0xf8   : > { %1777 = vmatprep.mubr.msk.f32.mxu1 %vm2298_vm1, %v2299_v1  ;;  %p2201_p7 = por %p2200_p9, %p2199_p8 }
  0xfa   : > { %1843 = vmatpush3.bf16.msra.mxu0 %v1842_v17  ;;  %v1386_v17 = vld [vmem:[#allocation16 + $0x10] sm:$0xff]  ;;  %p2202_p11 = pnand %p2201_p7, %p2195_p12 }
  0xfb   : > { %1795 = vmatprep.subr.mxu0 %v2299_v1 }
  0xfd   : > { %1773 = vmatmul.mubr.msk.f32.vlgmr.msra.gmra.mrb[2].mxu0 %vm451_vm0, %v622_v18  ;;  %v1387_v18 = vld [vmem:[#allocation16 + $0x18] sm:$0xff] }
  0xfe   : > { %1797 = vmatprep.mubr.msk.f32.mxu0 %vm2298_vm1, %v2299_v1  ;;  %v1848_v20 = vpack.c.bf16 %v1387_v18, %v1386_v17 }
 0x1c8   : > { %v535_v23 = vpop.f32.mrb[0].mxu0 }
 0x1c9   : > { %541 = vst.msk [vmem:[#allocation3] sm:$0xff] %vm451_vm0, %v535_v23  ;;  %v1752_v24 = vpop.f32.mrb[1].mxu0 }
 0x1ca   : > { %v616_v28 = vpop.f32.mrb[0].mxu1 }
 0x1cb   : > { %621 = vst.msk [vmem:[#allocation4] sm:$0xff] %vm451_vm0, %v616_v28  ;;  %v1763_v29 = vpop.f32.mrb[1].mxu1 }
 0x1d0   : > { %v699_v25 = vpop.f32.mrb[2].mxu0  ;;  %v705_v26 = vld [vmem:[#allocation3] sm:$0xff] }
 0x1d1   : > { %1776 = vmatpush3.xpose.msk.msra.mxu1 %vm708_vm2, %v705_v26  ;;  %869 = vrot.lane.b32.xlu1 %v699_v25, %s2300_s30  ;;  %v1774_v27 = vpop.f32.mrb[3].mxu0 }
 0x1d2   : > { %1780 = vmatprep.subr.mxu1 %v2299_v1  ;;  %v707_v30 = vld [vmem:[#allocation4] sm:$0xff] }
 0x1d4   : > { %1778 = vmatmul.mubr.msk.f32.vlgmr.msra.gmra.mrb[2].mxu1 %vm708_vm2, %v699_v25 }
 0x1d5   : > { %1037 = vrot.lane.b32.xlu1 %v705_v26, %s2301_s20  ;;  %1782 = vmatprep.mubr.msk.f32.mxu1 %vm2298_vm1, %v2299_v1 }
 0x1d6   : > { %1781 = vmatpush3.msra.mxu1 %v707_v30 }
 0x1d7   : > { %1785 = vmatprep.subr.mxu1 %v2299_v1 }
 0x1d9   : > { %1035 = vrot.lane.b32.xlu1 %v699_v25, %s2301_s20 }
 0x1dd   : > { %1202 = vrot.lane.b32.xlu1 %v705_v26, %s2302_s17 }
 0x1e1   : > { %1200 = vrot.lane.b32.xlu1 %v699_v25, %s2302_s17 }
 0x1e5   : > { %1122 = vrot.lane.b32.xlu1 %v707_v30, %s2301_s20 }
 0x243   : > { %v870_v31 = vpop.permute.xlu1 %869 }
 0x247   : > { %v1038_v32 = vpop.permute.xlu1 %1037 }
 0x248   : > { %1796 = vmatpush3.xpose.msk.msra.mxu0 %vm708_vm2, %v1038_v32 }
 0x249   : > { %1805 = vmatprep.subr.mxu0 %v2299_v1 }
 0x24b   : > { %v1036_v33 = vpop.permute.xlu1 %1035 }
 0x24c   : > { %1798 = vmatmul.mubr.msk.f32.vlgmr.msra.gmra.mrb[4].mxu0 %vm708_vm2, %v1036_v33 }
 0x24d   : > { %1807 = vmatprep.mubr.msk.f32.mxu0 %vm2298_vm1, %v2299_v1 }
 0x24f   : > { %v1203_v34 = vpop.permute.xlu1 %1202 }
 0x250   : > { %1806 = vmatpush3.xpose.msk.msra.mxu0 %vm708_vm2, %v1203_v34 }
 0x251   : > { %1844 = vmatprep.subr.bf16.mxu0 %v2297_v0 }
 0x253   : > { %v1201_v35 = vpop.permute.xlu1 %1200 }
 0x254   : > { %1808 = vmatmul.mubr.msk.f32.vlgmr.msra.gmra.mrb[6].mxu0 %vm708_vm2, %v1201_v35 }
 0x255   : > { %1823 = vmatprep.mubr.msk.f32.mxu0 %vm2298_vm1, %v2299_v1  ;;  %1846 = vmatpush3.bf16.msra.mxu0 %v1845_v16 }
 0x256   : > { %1847 = vmatprep.subr.bf16.mxu0 %v2297_v0 }
 0x257   : > { %v1123_v61 = vpop.permute.xlu1 %1122 }
 0x259   : > { %1849 = vmatpush3.bf16.msra.mxu0 %v1848_v20 }
 0x2a7   : > { %v781_v36 = vpop.f32.mrb[2].mxu1 }
 0x2a8   : > { %v1779_v37 = vpop.f32.mrb[3].mxu1  ;;  %v785_v38 = vsel %vm708_vm2, %v781_v36, -inf }
 0x2a9   : > { %786 = vmax.xlane.f32.xlu0 %v785_v38 }
 0x2bf   : > { %871 = vrot.lane.b32.xlu0 %v705_v26, %s2300_s30 }
 0x31f   : > { %v1109_v39 = vpop.f32.mrb[4].mxu0 }
 0x320   : > { %v1799_v40 = vpop.f32.mrb[5].mxu0  ;;  %v1113_v41 = vsel %vm708_vm2, %v1109_v39, -inf }
 0x321   : > { %1114 = vmax.xlane.f32.xlu0 %v1113_v41  ;;  %v1382_v40 = vld [vmem:[#allocation2] sm:$0xff] }
 0x327   : > { %v1274_v42 = vpop.f32.mrb[6].mxu0 }
 0x328   : > { %v1809_v43 = vpop.f32.mrb[7].mxu0  ;;  %v1278_v44 = vsel %vm708_vm2, %v1274_v42, -inf }
 0x329   : > { %1279 = vmax.xlane.f32.xlu1 %v1278_v44 }
 0x336   : > { %v787_v45 = vpop.xlane.xlu0 %786 }
 0x337   : > { %v788_v46 = vsub.f32 %v781_v36, %v787_v45  ;;  %957 = vrot.lane.b32.xlu0 %v707_v30, %s2300_s30 }
 0x339   : > { %v789_v47 = vmul.f32 1.442695, %v788_v46 }
 0x33a   : > { %v872_v49 = vpop.permute.xlu0 %871 }
 0x33b   : > { %1974 = vpow2.f32 %v789_v47 }
 0x345   : > { %v1975_v48 = vpop.eup %1974 }
 0x346   : > { %1783 = vmatmul.mubr.msk.f32.vlgmr.msra.gmra.mrb[4].mxu1 %vm708_vm2, %v1975_v48  ;;  %v791_v11 = vsel %vm708_vm2, %v1975_v48, 0.0 }
 0x347   : > { %1786 = vmatpush3.xpose.msk.msra.mxu1 %vm708_vm2, %v872_v49  ;;  %1787 = vmatprep.mubr.msk.f32.mxu1 %vm2298_vm1, %v2299_v1 }
 0x348   : > { %1790 = vmatprep.subr.mxu1 %v2299_v1 }
 0x34a   : > { %1788 = vmatmul.mubr.msk.f32.vlgmr.msra.gmra.mrb[6].mxu1 %vm708_vm2, %v870_v31 }
 0x34b   : > { %1792 = vmatprep.mubr.msk.f32.mxu1 %vm2298_vm1, %v2299_v1 }
 0x3ae   : > { %v1115_v50 = vpop.xlane.xlu0 %1114 }
 0x3af   : > { %v1116_v51 = vsub.f32 %v1109_v39, %v1115_v50 }
 0x3b1   : > { %v1117_v58 = vmul.f32 1.442695, %v1116_v51 }
 0x3b2   : > { %v958_v52 = vpop.permute.xlu0 %957 }
 0x3b3   : > { %1791 = vmatpush3.msra.mxu1 %v958_v52  ;;  %1976 = vpow2.f32 %v1117_v58 }
 0x3b4   : > { %1800 = vmatprep.subr.mxu1 %v2299_v1 }
 0x3b6   : > { %v1280_v62 = vpop.xlane.xlu1 %1279 }
 0x3b7   : > { %v1281_v63 = vsub.f32 %v1274_v42, %v1280_v62 }
 0x3b9   : > { %v1282_v4 = vmul.f32 1.442695, %v1281_v63 }
 0x3bd   : > { %v1977_v59 = vpop.eup %1976 }
 0x3be   : > { %v1119_v60 = vsel %vm708_vm2, %v1977_v59, 0.0 }
 0x419   : > { %v2739_v53 = vpop.f32.mrb[4].mxu1 }
 0x41a   : > { %v1784_v54 = vpop.f32.mrb[5].mxu1 }
 0x41d   : > { %v943_v55 = vpop.f32.mrb[6].mxu1 }
 0x41e   : > { %v1789_v56 = vpop.f32.mrb[7].mxu1  ;;  %v947_v57 = vsel %vm708_vm2, %v943_v55, -inf }
 0x41f   : > { %948 = vmax.xlane.f32.xlu1 %v947_v57 }
 0x430   : > { %1287 = vrot.lane.b32.xlu1 %v707_v30, %s2302_s17 }
 0x454   : > { %1120 = vadd.xlane.f32.xlu1 %v1119_v60 }
 0x4ac   : > { %v949_v2 = vpop.xlane.xlu1 %948 }
 0x4ad   : > { %v950_v3 = vsub.f32 %v943_v55, %v949_v2 }
 0x4af   : > { %v951_v5 = vmul.f32 1.442695, %v950_v3 }
 0x4b0   : > { %v1288_v9 = vpop.permute.xlu1 %1287 }
 0x4b1   : > { %1978 = vpow2.f32 %v951_v5 }
 0x4b2   : > { %1980 = vpow2.f32 %v1282_v4 }
 0x4bb   : > { %v1979_v6 = vpop.eup %1978 }
 0x4bc   : > { %1793 = vmatmul.mubr.msk.f32.vlgmr.msra.gmra.mrb[8].mxu1 %vm708_vm2, %v1979_v6  ;;  %v953_v7 = vsel %vm708_vm2, %v1979_v6, 0.0  ;;  %v1981_v8 = vpop.eup %1980 }
 0x4bd   : > { %1801 = vmatpush3.msra.mxu1 %v1123_v61  ;;  %954 = vadd.xlane.f32.xlu0 %v953_v7  ;;  %v1284_v10 = vsel %vm708_vm2, %v1981_v8, 0.0 }
 0x4be   : > { %1802 = vmatprep.mubr.msk.f32.mxu1 %vm2298_vm1, %v2299_v1  ;;  %1810 = vmatprep.subr.mxu1 %v2299_v1 }
 0x4c0   : > { %1803 = vmatmul.mubr.msk.f32.vlgmr.msra.gmra.mrb[10].mxu1 %vm708_vm2, %v1977_v59 }
 0x4c1   : > { %1811 = vmatpush3.msra.mxu1 %v1288_v9  ;;  %1285 = vadd.xlane.f32.xlu0 %v1284_v10 }
 0x4c2   : > { %1812 = vmatprep.mubr.msk.f32.mxu1 %vm2298_vm1, %v2299_v1 }
 0x4c4   : > { %1813 = vmatmul.mubr.msk.f32.vlgmr.msra.gmra.mrb[12].mxu1 %vm708_vm2, %v1981_v8 }
 0x4c5   : > { %792 = vadd.xlane.f32.xlu0 %v791_v11 }
 0x4e1   : > { %v1121_v15 = vpop.xlane.xlu1 %1120 }
 0x54a   : > { %v955_v12 = vpop.xlane.xlu0 %954 }
 0x54b   : > { %1982 = vrcp.f32 %v955_v12 }
 0x54c   : > { %1984 = vrcp.f32 %v1121_v15 }
 0x54e   : > { %v1286_v19 = vpop.xlane.xlu0 %1285 }
 0x54f   : > { %1986 = vrcp.f32 %v1286_v19 }
 0x552   : > { %v793_v31 = vpop.xlane.xlu0 %792 }
 0x553   : > { %1988 = vrcp.f32 %v793_v31 }
 0x555   : > { %v1983_v1 = vpop.eup %1982 }
 0x556   : > { %v1985_v24 = vpop.eup %1984 }
 0x559   : > { %v1987_v28 = vpop.eup %1986 }
 0x55d   : > { %v1989_v32 = vpop.eup %1988 }
 0x55e   : > { %v868_v34 = vmul.f32 %v1989_v32, %v2739_v53 }
 0x58f   : > { %v1029_v21 = vpop.f32.mrb[8].mxu1 }
 0x590   : > { %v1034_v22 = vmul.f32 %v1983_v1, %v1029_v21  ;;  %v1794_v23 = vpop.f32.mrb[9].mxu1 }
 0x592   : > { %1366 = vrot.lane.b32.xlu1 %v1034_v22, %s2303_s15 }
 0x593   : > { %v1194_v25 = vpop.f32.mrb[10].mxu1 }
 0x594   : > { %v1199_v26 = vmul.f32 %v1985_v24, %v1194_v25  ;;  %v1804_v27 = vpop.f32.mrb[11].mxu1 }
 0x596   : > { %1370 = vrot.lane.b32.xlu0 %v1199_v26, %s2304_s3 }
 0x597   : > { %v1359_v0 = vpop.f32.mrb[12].mxu1 }
 0x598   : > { %v1364_v29 = vmul.f32 %v1987_v28, %v1359_v0  ;;  %v1814_v30 = vpop.f32.mrb[13].mxu1 }
 0x59a   : > { %1374 = vrot.lane.b32.xlu1 %v1364_v29, %s2305_s10 }
 0x604   : > { %v1367_v33 = vpop.permute.xlu1 %1366 }
 0x605   : > { %v1377_v36 = vsel %vm708_vm2, %v868_v34, %v1367_v33 }
 0x608   : > { %v1371_v35 = vpop.permute.xlu0 %1370 }
 0x609   : > { %v1379_v37 = vsel %vm1378_vm3, %v1377_v36, %v1371_v35 }
 0x60c   : > { %v1375_v38 = vpop.permute.xlu1 %1374 }
 0x60d   : > { %v1381_v39 = vsel %vm1380_vm4, %v1379_v37, %v1375_v38 }
 0x60e   : > { %1824 = vmatmul.mubr.msk.f32.vlgmr.msra.gmra.mrb[8].mxu0 %vm451_vm0, %v1381_v39 }
 0x6e1   : > { %v1457_v41 = vpop.f32.mrb[8].mxu0 }
 0x6e2   : > { %v1461_v42 = vadd.f32 %v1457_v41, %v1382_v40  ;;  %v1825_v43 = vpop.f32.mrb[9].mxu0 }
 0x6e4   : > { %1462 = vst.msk [vmem:[#allocation2] sm:$0xff] %vm451_vm0, %v1461_v42 }
 0x6eb   : > { %v1466_v44 = vld [vmem:[#allocation2] sm:$0xff] }
 0x6ec   : > { %1467 = vst.msk [vmem:[%s446_s7] sm:$0xff] %vm451_vm0, %v1466_v44 }
 0x6ed   : > { %2205 = shalt.err (!%p2202_p11)
}
 0x6ee   : > { %s2206_s28 = scalar_lea.hbm %s2765_s5, 128  ;;  %s2210_s23 = scalar_lea.hbm %s2883_s13, 256 }
 0x6ef   : > { %p2207_p5 = scmp.ne.s32.totalorder %s2765_s5, %s2206_s28  ;;  %p2211_p0 = scmp.lt.u32.totalorder %s2765_s5, %s2883_s13 }
 0x6f0   : > { %p2212_p4 = scmp.lt.u32.totalorder %s2210_s23, %s2206_s28  ;;  %p2214_p13 = scmp.lt.u32.totalorder %s2206_s28, %s2765_s5 }
 0x6f1   : > { %p2208_p3 = pnand %p2207_p5, %p2884_p2 }
 0x6f2   : > { %p2213_p10 = por %p2212_p4, %p2211_p0 }
 0x6f3   : > { %p2209_p6 = pneg %p2208_p3 }
 0x6f4   : > { %p2215_p1 = por %p2214_p13, %p2213_p10 }
 0x6f6   : > { %p2216_p12 = pnand %p2215_p1, %p2209_p6 }
 0x6f8   : > { %2219 = shalt.err (!%p2216_p12)
}
 0x6f9   : > { %1872 = dma.vmem_to_hbm [thread:$0]  (%p2884_p2), %s2767_s22, 128, %s2765_s5, %s1469_s9  }
 0x6fa PF: > { %s2885_s30 = sld [smem:[#allocation23_spill]]  ;;  %s2886_s20 = sld [smem:[#allocation28_spill]] }
 0x6fb   : > { %s2887_s17 = sld [smem:[#allocation25_spill]] }
 0x700   : > { %s1495_s15 = sand.u32 1, %s2885_s30   ;;  %p2888_p8 = scmp.ne.s32.totalorder %s2886_s20, 0 }
 0x701   : > { %p2889_p9 = scmp.ge.s32.totalorder %s2887_s17, 2  ;;  %s1496_s3 = scalar_lea.sflag [#allocation7], %s1495_s15 }
 0x703   : > { %p1898_p7 = pnand %p2889_p9, %p2888_p8 }
 0x705   : > { %2261 = dma.done.wait (!%p1898_p7), %s1496_s3, 128  }
 0x706   : > { %2263 = vsyncadd (!%p1898_p7), %s1496_s3, 4294967168  ;;  %s28_s29 = sadd.s32 1, %s2887_s17   ;;  %s2890_s21 = sld [smem:[#allocation27_spill]] }
 0x707   : > { %p25_p11 = scmp.ge.s32.totalorder %s28_s29, 4   ;;  %s2891_s27 = sld [smem:[#allocation24_spill]] }
 0x708   : > { %s2892_s28 = sld [smem:[#allocation26_spill]]  ;;  %s2893_s24 = smov %s2270_s25 }
 0x709   : > { %s2894_s25 = smov %s2274_s26  ;;  %27 = sbr.rel (!%p25_p11) target bundleno = 15 (0xf), region = 153 }
 0x70c   : > { %s2895_s26 = smov %s2890_s21 }
 0x710   :  { %1501 = vsyncpa [#allocation6], 1 }
 0x711   :  { %1503 = vsyncpa [#allocation6 + $0x1], 1 }
 0x712   :  { %1504 = vsyncpa [#allocation9], 1 }
 0x713   :  { %1506 = vsyncpa [#allocation9 + $0x1], 1 }
 0x714   :  { %1507 = vsyncpa [#allocation12], 1 }
 0x715   :  { %1508 = vsyncpa [#allocation15], 1 }
 0x716   :  { %1509 = vsyncpa [#allocation7], 1 }
 0x717   :  { %1511 = vsyncpa [#allocation7 + $0x1], 1 }

</bundles_post_ra>
